<compile_context>
chip_gen: v7x
topology: tpu7x:2x2x1
jax: 0.10.0
libtpu: 0.0.40
codegen_flags: <defaults>
</compile_context>

<pallas_src>
import math

import jax
import jax.numpy as jnp
import numpy as np
from jax.experimental import pallas as pl
from jax.experimental.pallas import tpu as pltpu


def _sigmoid(x):
    # sigmoid(x) == 0.5 * (tanh(x/2) + 1): single EUP op per gate (no exp+div).
    return 0.5 * (jnp.tanh(0.5 * x) + 1.0)


def lstm_kernel(x_ref, wih_ref, whh_ref, b_ref, wlin_ref, blin_ref,
                out_ref, xw_scr):
    """Single-invocation LSTM + Linear + Sigmoid.

    x_ref    : (T*Bp, D)    bf16  time-major, batch-padded input
    wih_ref  : (D, 4*Hp)    bf16  W_ih^T, each H-wide gate block zero-padded to Hp
    whh_ref  : (H, 4*Hp)    bf16  W_hh^T, per-gate column padding only (no zero rows)
    b_ref    : (1, 4*Hp)    f32   b_ih + b_hh, per-gate zero-padded
    wlin_ref : (H, O)       f32   W_lin^T (no zero rows)
    blin_ref : (1, O)       f32
    out_ref  : (Bp, O)      f32
    xw_scr   : (T*Bp, 4*Hp) f32   VMEM scratch for the hoisted input projection

    h/c are kept at their true width H (=64).  Gate blocks live at 128-lane
    aligned column offsets (0, Hp, 2Hp, 3Hp) and only the first H lanes of each
    block are read, so the zero-padded gate lanes never feed back into h or c:
    correctness does not depend on any padded-lane invariant (and W_hh / W_lin
    carry no zero rows any more).
    """
    TB = x_ref.shape[0]
    H = whh_ref.shape[0]
    Hp = whh_ref.shape[1] // 4
    Bp = out_ref.shape[0]
    T = TB // Bp

    # Hoisted input projection for all timesteps at once (no sequential dep).
    # bf16 operands -> single-pass MXU; f32 accumulation; bias folded in.
    xw_scr[...] = (jnp.dot(x_ref[...], wih_ref[...],
                           preferred_element_type=jnp.float32)
                   + b_ref[...])

    h = jnp.zeros((Bp, H), jnp.float32)
    c = jnp.zeros((Bp, H), jnp.float32)

    # T is static and small -> fully unrolled at trace time; all slices static.
    for t in range(T):
        hh = jnp.dot(h.astype(jnp.bfloat16), whh_ref[...],
                     preferred_element_type=jnp.float32)
        gates = xw_scr[pl.ds(t * Bp, Bp), :] + hh
        # PyTorch gate order: input, forget, cell(g), output.
        i_g = _sigmoid(gates[:, 0 * Hp:0 * Hp + H])
        f_g = _sigmoid(gates[:, 1 * Hp:1 * Hp + H])
        g_g = jnp.tanh(gates[:, 2 * Hp:2 * Hp + H])
        o_g = _sigmoid(gates[:, 3 * Hp:3 * Hp + H])
        c = f_g * c + i_g * g_g
        h = o_g * jnp.tanh(c)

    # Linear + Sigmoid head on h_T (== PyTorch self.hidden[0]).  Tiny matmul,
    # kept in f32 for output fidelity.
    logits = (jnp.dot(h, wlin_ref[...], preferred_element_type=jnp.float32)
              + blin_ref[...])
    out_ref[...] = _sigmoid(logits).astype(out_ref.dtype)


def _round_up(x, m):
    return ((x + m - 1) // m) * m


def prepare_params(w_ih, w_hh, b_ih, b_hh, w_lin, b_lin, Hp=128):
    """Host-side (numpy) weight prep; call ONCE at init and reuse the arrays.

    Transposes to right-multiply layout, zero-pads each H-wide gate column
    block to Hp (vreg alignment), casts the matmul weights to bf16, and keeps
    NO K-dimension (row) padding on W_hh / W_lin.
    """
    w_ih = np.asarray(w_ih, np.float32)
    w_hh = np.asarray(w_hh, np.float32)
    b = np.asarray(b_ih, np.float32) + np.asarray(b_hh, np.float32)
    w_lin = np.asarray(w_lin, np.float32)
    b_lin = np.asarray(b_lin, np.float32)
    H = w_hh.shape[1]

    def pad_gate_cols(w2d):  # (..., 4H) -> (..., 4Hp), zero-pad each gate block
        parts = []
        for g in range(4):
            blk = w2d[..., g * H:(g + 1) * H]
            pad_width = [(0, 0)] * (blk.ndim - 1) + [(0, Hp - H)]
            parts.append(np.pad(blk, pad_width))
        return np.concatenate(parts, axis=-1)

    wih_p = jnp.asarray(pad_gate_cols(w_ih.T), jnp.bfloat16)            # (D, 4Hp)
    whh_p = jnp.asarray(pad_gate_cols(w_hh.T), jnp.bfloat16)            # (H, 4Hp)
    b_p = jnp.asarray(pad_gate_cols(b.reshape(1, 4 * H)), jnp.float32)  # (1, 4Hp)
    wlin_p = jnp.asarray(w_lin.T, jnp.float32)                          # (H, O)
    blin_p = jnp.asarray(b_lin.reshape(1, -1), jnp.float32)             # (1, O)
    return (wih_p, whh_p, b_p, wlin_p, blin_p)


def lstm_forward(x, padded_params):
    """x: (B, T, D) batch_first f32, like the PyTorch module. Returns (1, B, O)."""
    (wih_p, whh_p, b_p, wlin_p, blin_p) = padded_params
    B, T, D = x.shape
    Hp = b_p.shape[1] // 4
    O = wlin_p.shape[1]
    Bp = _round_up(B, 8)                                   # sublane-align batch

    x_tm = jnp.transpose(x, (1, 0, 2))                     # time-major (T, B, D)
    x_tm = jnp.pad(x_tm, ((0, 0), (0, Bp - B), (0, 0)))    # (T, Bp, D)
    x2d = x_tm.reshape(T * Bp, D).astype(jnp.bfloat16)     # (T*Bp, D) bf16

    out = pl.pallas_call(
        lstm_kernel,
        out_shape=jax.ShapeDtypeStruct((Bp, O), jnp.float32),
        in_specs=[pl.BlockSpec(memory_space=pltpu.MemorySpace.VMEM)] * 6,
        out_specs=pl.BlockSpec(memory_space=pltpu.MemorySpace.VMEM),
        scratch_shapes=[pltpu.VMEM((T * Bp, 4 * Hp), jnp.float32)],
    )(x2d, wih_p, whh_p, b_p, wlin_p, blin_p)

    # Drop padded batch rows; matches sigmoid(linear(hidden[0])) -> (1, B, O).
    return out[:B].reshape(1, B, O)


def lstm_reference(x, w_ih, w_hh, b_ih, b_hh, w_lin, b_lin):
    """Pure-numpy float64 reference of the same forward pass (PyTorch layout)."""
    x = np.asarray(x, np.float64)
    w_ih = np.asarray(w_ih, np.float64)
    w_hh = np.asarray(w_hh, np.float64)
    b = np.asarray(b_ih, np.float64) + np.asarray(b_hh, np.float64)
    w_lin = np.asarray(w_lin, np.float64)
    b_lin = np.asarray(b_lin, np.float64)
    B, T, _ = x.shape
    H = w_hh.shape[1]

    def sig(v):
        return 1.0 / (1.0 + np.exp(-v))

    h = np.zeros((B, H), np.float64)
    c = np.zeros((B, H), np.float64)
    for t in range(T):
        gates = x[:, t, :] @ w_ih.T + h @ w_hh.T + b
        i_g = sig(gates[:, 0:H])
        f_g = sig(gates[:, H:2 * H])
        g_g = np.tanh(gates[:, 2 * H:3 * H])
        o_g = sig(gates[:, 3 * H:4 * H])
        c = f_g * c + i_g * g_g
        h = o_g * np.tanh(c)
    out = sig(h @ w_lin.T + b_lin)
    return out.reshape(1, B, -1)


if __name__ == "__main__":
    # Shapes consistent with the module: input_dim=36, hidden_dim=64, output_dim=35
    B, T = 2, 8
    D, H, O = 36, 64, 35
    Hp = 128  # vreg-lane-aligned padded per-gate width used inside the kernel

    key = jax.random.PRNGKey(0)
    ks = jax.random.split(key, 7)
    bound = 1.0 / math.sqrt(H)   # PyTorch nn.LSTM / nn.Linear default init range

    w_ih = jax.random.uniform(ks[0], (4 * H, D), minval=-bound, maxval=bound, dtype=jnp.float32)
    w_hh = jax.random.uniform(ks[1], (4 * H, H), minval=-bound, maxval=bound, dtype=jnp.float32)
    b_ih = jax.random.uniform(ks[2], (4 * H,), minval=-bound, maxval=bound, dtype=jnp.float32)
    b_hh = jax.random.uniform(ks[3], (4 * H,), minval=-bound, maxval=bound, dtype=jnp.float32)
    w_lin = jax.random.uniform(ks[4], (O, H), minval=-bound, maxval=bound, dtype=jnp.float32)
    b_lin = jax.random.uniform(ks[5], (O,), minval=-bound, maxval=bound, dtype=jnp.float32)

    x = jax.random.normal(ks[6], (B, T, D), dtype=jnp.float32)

    # Weight prep is host-side numpy, done once and reused across calls.
    padded_params = prepare_params(w_ih, w_hh, b_ih, b_hh, w_lin, b_lin, Hp=Hp)

    y = lstm_forward(x, padded_params)
    jax.block_until_ready(y)

    y_ref = lstm_reference(np.asarray(x), np.asarray(w_ih), np.asarray(w_hh),
                           np.asarray(b_ih), np.asarray(b_hh),
                           np.asarray(w_lin), np.asarray(b_lin))
    # bf16 matmul operands in the kernel -> relaxed tolerance vs. the f64 reference.
    np.testing.assert_allclose(np.asarray(y), y_ref, atol=2e-2, rtol=2e-2)
    assert y.shape == (1, B, O)

    print("KERNEL_OK")
</pallas_src>

<mosaic_0001>
module attributes {stable_mosaic.version = 11 : i64} {
  func.func @lstm_kernel(%arg0: memref<64x36xbf16, #tpu.memory_space<vmem>>, %arg1: memref<36x512xbf16, #tpu.memory_space<vmem>>, %arg2: memref<64x512xbf16, #tpu.memory_space<vmem>>, %arg3: memref<1x512xf32, #tpu.memory_space<vmem>>, %arg4: memref<64x35xf32, #tpu.memory_space<vmem>>, %arg5: memref<1x35xf32, #tpu.memory_space<vmem>>, %arg6: memref<8x35xf32, #tpu.memory_space<vmem>>, %arg7: memref<64x512xf32, #tpu.memory_space<vmem>>) attributes {dimension_semantics = [], scalar_prefetch = 0 : i64, scratch_operands = 1 : i64, tpu.core_type = #tpu.core_type<tc>} {
    %c0 = arith.constant 0 : index
    %c0_0 = arith.constant 0 : index
    %0 = vector.load %arg0[%c0, %c0_0] : memref<64x36xbf16, #tpu.memory_space<vmem>>, vector<64x36xbf16>
    %c0_1 = arith.constant 0 : index
    %c0_2 = arith.constant 0 : index
    %1 = vector.load %arg1[%c0_1, %c0_2] : memref<36x512xbf16, #tpu.memory_space<vmem>>, vector<36x512xbf16>
    %cst = arith.constant dense<0.000000e+00> : vector<64x512xf32>
    %2 = tpu.matmul %0, %1, %cst {dimension_numbers = #tpu.dot_dimension_numbers<[1], [0], [0], [1], [0, 0, 1, 1], [], []>} : vector<64x36xbf16>, vector<36x512xbf16>, vector<64x512xf32> -> vector<64x512xf32>
    %c0_3 = arith.constant 0 : index
    %c0_4 = arith.constant 0 : index
    %3 = vector.load %arg3[%c0_3, %c0_4] : memref<1x512xf32, #tpu.memory_space<vmem>>, vector<1x512xf32>
    %4 = vector.broadcast %3 : vector<1x512xf32> to vector<64x512xf32>
    %5 = arith.addf %2, %4 : vector<64x512xf32>
    %c0_5 = arith.constant 0 : index
    %c0_6 = arith.constant 0 : index
    %6 = vector.load %arg7[%c0_5, %c0_6] : memref<64x512xf32, #tpu.memory_space<vmem>>, vector<64x512xf32>
    tpu.vector_store %arg7[%c0_5, %c0_6], %5 {strides = array<i32>} : memref<64x512xf32, #tpu.memory_space<vmem>>, vector<64x512xf32>,
    %cst_7 = arith.constant 0.000000e+00 : f32
    %7 = vector.broadcast %cst_7 : f32 to vector<8x64xf32>
    %cst_8 = arith.constant 0.000000e+00 : f32
    %8 = vector.broadcast %cst_8 : f32 to vector<8x64xf32>
    %9 = arith.truncf %7 : vector<8x64xf32> to vector<8x64xbf16>
    %c0_9 = arith.constant 0 : index
    %c0_10 = arith.constant 0 : index
    %10 = vector.load %arg2[%c0_9, %c0_10] : memref<64x512xbf16, #tpu.memory_space<vmem>>, vector<64x512xbf16>
    %cst_11 = arith.constant dense<0.000000e+00> : vector<8x512xf32>
    %11 = tpu.matmul %9, %10, %cst_11 {dimension_numbers = #tpu.dot_dimension_numbers<[1], [0], [0], [1], [0, 0, 1, 1], [], []>} : vector<8x64xbf16>, vector<64x512xbf16>, vector<8x512xf32> -> vector<8x512xf32>
    %c0_12 = arith.constant 0 : index
    %c0_13 = arith.constant 0 : index
    %12 = vector.load %arg7[%c0_12, %c0_13] : memref<64x512xf32, #tpu.memory_space<vmem>>, vector<8x512xf32>
    %13 = arith.addf %12, %11 : vector<8x512xf32>
    %14 = vector.extract_strided_slice %13 {offsets = [0, 0], sizes = [8, 64], strides = [1, 1]} : vector<8x512xf32> to vector<8x64xf32>
    %cst_14 = arith.constant 5.000000e-01 : f32
    %15 = vector.broadcast %cst_14 : f32 to vector<8x64xf32>
    %16 = arith.mulf %15, %14 : vector<8x64xf32>
    %17 = math.tanh %16 : vector<8x64xf32>
    %cst_15 = arith.constant 1.000000e+00 : f32
    %18 = vector.broadcast %cst_15 : f32 to vector<8x64xf32>
    %19 = arith.addf %17, %18 : vector<8x64xf32>
    %cst_16 = arith.constant 5.000000e-01 : f32
    %20 = vector.broadcast %cst_16 : f32 to vector<8x64xf32>
    %21 = arith.mulf %20, %19 : vector<8x64xf32>
    %22 = vector.extract_strided_slice %13 {offsets = [0, 128], sizes = [8, 64], strides = [1, 1]} : vector<8x512xf32> to vector<8x64xf32>
    %cst_17 = arith.constant 5.000000e-01 : f32
    %23 = vector.broadcast %cst_17 : f32 to vector<8x64xf32>
    %24 = arith.mulf %23, %22 : vector<8x64xf32>
    %25 = math.tanh %24 : vector<8x64xf32>
    %cst_18 = arith.constant 1.000000e+00 : f32
    %26 = vector.broadcast %cst_18 : f32 to vector<8x64xf32>
    %27 = arith.addf %25, %26 : vector<8x64xf32>
    %cst_19 = arith.constant 5.000000e-01 : f32
    %28 = vector.broadcast %cst_19 : f32 to vector<8x64xf32>
    %29 = arith.mulf %28, %27 : vector<8x64xf32>
    %30 = vector.extract_strided_slice %13 {offsets = [0, 256], sizes = [8, 64], strides = [1, 1]} : vector<8x512xf32> to vector<8x64xf32>
    %31 = math.tanh %30 : vector<8x64xf32>
    %32 = vector.extract_strided_slice %13 {offsets = [0, 384], sizes = [8, 64], strides = [1, 1]} : vector<8x512xf32> to vector<8x64xf32>
    %cst_20 = arith.constant 5.000000e-01 : f32
    %33 = vector.broadcast %cst_20 : f32 to vector<8x64xf32>
    %34 = arith.mulf %33, %32 : vector<8x64xf32>
    %35 = math.tanh %34 : vector<8x64xf32>
    %cst_21 = arith.constant 1.000000e+00 : f32
    %36 = vector.broadcast %cst_21 : f32 to vector<8x64xf32>
    %37 = arith.addf %35, %36 : vector<8x64xf32>
    %cst_22 = arith.constant 5.000000e-01 : f32
    %38 = vector.broadcast %cst_22 : f32 to vector<8x64xf32>
    %39 = arith.mulf %38, %37 : vector<8x64xf32>
    %40 = arith.mulf %29, %8 : vector<8x64xf32>
    %41 = arith.mulf %21, %31 : vector<8x64xf32>
    %42 = arith.addf %40, %41 : vector<8x64xf32>
    %43 = math.tanh %42 : vector<8x64xf32>
    %44 = arith.mulf %39, %43 : vector<8x64xf32>
    %45 = arith.truncf %44 : vector<8x64xf32> to vector<8x64xbf16>
    %c0_23 = arith.constant 0 : index
    %c0_24 = arith.constant 0 : index
    %46 = vector.load %arg2[%c0_23, %c0_24] : memref<64x512xbf16, #tpu.memory_space<vmem>>, vector<64x512xbf16>
    %cst_25 = arith.constant dense<0.000000e+00> : vector<8x512xf32>
    %47 = tpu.matmul %45, %46, %cst_25 {dimension_numbers = #tpu.dot_dimension_numbers<[1], [0], [0], [1], [0, 0, 1, 1], [], []>} : vector<8x64xbf16>, vector<64x512xbf16>, vector<8x512xf32> -> vector<8x512xf32>
    %c8 = arith.constant 8 : index
    %c0_26 = arith.constant 0 : index
    %48 = vector.load %arg7[%c8, %c0_26] : memref<64x512xf32, #tpu.memory_space<vmem>>, vector<8x512xf32>
    %49 = arith.addf %48, %47 : vector<8x512xf32>
    %50 = vector.extract_strided_slice %49 {offsets = [0, 0], sizes = [8, 64], strides = [1, 1]} : vector<8x512xf32> to vector<8x64xf32>
    %cst_27 = arith.constant 5.000000e-01 : f32
    %51 = vector.broadcast %cst_27 : f32 to vector<8x64xf32>
    %52 = arith.mulf %51, %50 : vector<8x64xf32>
    %53 = math.tanh %52 : vector<8x64xf32>
    %cst_28 = arith.constant 1.000000e+00 : f32
    %54 = vector.broadcast %cst_28 : f32 to vector<8x64xf32>
    %55 = arith.addf %53, %54 : vector<8x64xf32>
    %cst_29 = arith.constant 5.000000e-01 : f32
    %56 = vector.broadcast %cst_29 : f32 to vector<8x64xf32>
    %57 = arith.mulf %56, %55 : vector<8x64xf32>
    %58 = vector.extract_strided_slice %49 {offsets = [0, 128], sizes = [8, 64], strides = [1, 1]} : vector<8x512xf32> to vector<8x64xf32>
    %cst_30 = arith.constant 5.000000e-01 : f32
    %59 = vector.broadcast %cst_30 : f32 to vector<8x64xf32>
    %60 = arith.mulf %59, %58 : vector<8x64xf32>
    %61 = math.tanh %60 : vector<8x64xf32>
    %cst_31 = arith.constant 1.000000e+00 : f32
    %62 = vector.broadcast %cst_31 : f32 to vector<8x64xf32>
    %63 = arith.addf %61, %62 : vector<8x64xf32>
    %cst_32 = arith.constant 5.000000e-01 : f32
    %64 = vector.broadcast %cst_32 : f32 to vector<8x64xf32>
    %65 = arith.mulf %64, %63 : vector<8x64xf32>
    %66 = vector.extract_strided_slice %49 {offsets = [0, 256], sizes = [8, 64], strides = [1, 1]} : vector<8x512xf32> to vector<8x64xf32>
    %67 = math.tanh %66 : vector<8x64xf32>
    %68 = vector.extract_strided_slice %49 {offsets = [0, 384], sizes = [8, 64], strides = [1, 1]} : vector<8x512xf32> to vector<8x64xf32>
    %cst_33 = arith.constant 5.000000e-01 : f32
    %69 = vector.broadcast %cst_33 : f32 to vector<8x64xf32>
    %70 = arith.mulf %69, %68 : vector<8x64xf32>
    %71 = math.tanh %70 : vector<8x64xf32>
    %cst_34 = arith.constant 1.000000e+00 : f32
    %72 = vector.broadcast %cst_34 : f32 to vector<8x64xf32>
    %73 = arith.addf %71, %72 : vector<8x64xf32>
    %cst_35 = arith.constant 5.000000e-01 : f32
    %74 = vector.broadcast %cst_35 : f32 to vector<8x64xf32>
    %75 = arith.mulf %74, %73 : vector<8x64xf32>
    %76 = arith.mulf %65, %42 : vector<8x64xf32>
    %77 = arith.mulf %57, %67 : vector<8x64xf32>
    %78 = arith.addf %76, %77 : vector<8x64xf32>
    %79 = math.tanh %78 : vector<8x64xf32>
    %80 = arith.mulf %75, %79 : vector<8x64xf32>
    %81 = arith.truncf %80 : vector<8x64xf32> to vector<8x64xbf16>
    %c0_36 = arith.constant 0 : index
    %c0_37 = arith.constant 0 : index
    %82 = vector.load %arg2[%c0_36, %c0_37] : memref<64x512xbf16, #tpu.memory_space<vmem>>, vector<64x512xbf16>
    %cst_38 = arith.constant dense<0.000000e+00> : vector<8x512xf32>
    %83 = tpu.matmul %81, %82, %cst_38 {dimension_numbers = #tpu.dot_dimension_numbers<[1], [0], [0], [1], [0, 0, 1, 1], [], []>} : vector<8x64xbf16>, vector<64x512xbf16>, vector<8x512xf32> -> vector<8x512xf32>
    %c16 = arith.constant 16 : index
    %c0_39 = arith.constant 0 : index
    %84 = vector.load %arg7[%c16, %c0_39] : memref<64x512xf32, #tpu.memory_space<vmem>>, vector<8x512xf32>
    %85 = arith.addf %84, %83 : vector<8x512xf32>
    %86 = vector.extract_strided_slice %85 {offsets = [0, 0], sizes = [8, 64], strides = [1, 1]} : vector<8x512xf32> to vector<8x64xf32>
    %cst_40 = arith.constant 5.000000e-01 : f32
    %87 = vector.broadcast %cst_40 : f32 to vector<8x64xf32>
    %88 = arith.mulf %87, %86 : vector<8x64xf32>
    %89 = math.tanh %88 : vector<8x64xf32>
    %cst_41 = arith.constant 1.000000e+00 : f32
    %90 = vector.broadcast %cst_41 : f32 to vector<8x64xf32>
    %91 = arith.addf %89, %90 : vector<8x64xf32>
    %cst_42 = arith.constant 5.000000e-01 : f32
    %92 = vector.broadcast %cst_42 : f32 to vector<8x64xf32>
    %93 = arith.mulf %92, %91 : vector<8x64xf32>
    %94 = vector.extract_strided_slice %85 {offsets = [0, 128], sizes = [8, 64], strides = [1, 1]} : vector<8x512xf32> to vector<8x64xf32>
    %cst_43 = arith.constant 5.000000e-01 : f32
    %95 = vector.broadcast %cst_43 : f32 to vector<8x64xf32>
    %96 = arith.mulf %95, %94 : vector<8x64xf32>
    %97 = math.tanh %96 : vector<8x64xf32>
    %cst_44 = arith.constant 1.000000e+00 : f32
    %98 = vector.broadcast %cst_44 : f32 to vector<8x64xf32>
    %99 = arith.addf %97, %98 : vector<8x64xf32>
    %cst_45 = arith.constant 5.000000e-01 : f32
    %100 = vector.broadcast %cst_45 : f32 to vector<8x64xf32>
    %101 = arith.mulf %100, %99 : vector<8x64xf32>
    %102 = vector.extract_strided_slice %85 {offsets = [0, 256], sizes = [8, 64], strides = [1, 1]} : vector<8x512xf32> to vector<8x64xf32>
    %103 = math.tanh %102 : vector<8x64xf32>
    %104 = vector.extract_strided_slice %85 {offsets = [0, 384], sizes = [8, 64], strides = [1, 1]} : vector<8x512xf32> to vector<8x64xf32>
    %cst_46 = arith.constant 5.000000e-01 : f32
    %105 = vector.broadcast %cst_46 : f32 to vector<8x64xf32>
    %106 = arith.mulf %105, %104 : vector<8x64xf32>
    %107 = math.tanh %106 : vector<8x64xf32>
    %cst_47 = arith.constant 1.000000e+00 : f32
    %108 = vector.broadcast %cst_47 : f32 to vector<8x64xf32>
    %109 = arith.addf %107, %108 : vector<8x64xf32>
    %cst_48 = arith.constant 5.000000e-01 : f32
    %110 = vector.broadcast %cst_48 : f32 to vector<8x64xf32>
    %111 = arith.mulf %110, %109 : vector<8x64xf32>
    %112 = arith.mulf %101, %78 : vector<8x64xf32>
    %113 = arith.mulf %93, %103 : vector<8x64xf32>
    %114 = arith.addf %112, %113 : vector<8x64xf32>
    %115 = math.tanh %114 : vector<8x64xf32>
    %116 = arith.mulf %111, %115 : vector<8x64xf32>
    %117 = arith.truncf %116 : vector<8x64xf32> to vector<8x64xbf16>
    %c0_49 = arith.constant 0 : index
    %c0_50 = arith.constant 0 : index
    %118 = vector.load %arg2[%c0_49, %c0_50] : memref<64x512xbf16, #tpu.memory_space<vmem>>, vector<64x512xbf16>
    %cst_51 = arith.constant dense<0.000000e+00> : vector<8x512xf32>
    %119 = tpu.matmul %117, %118, %cst_51 {dimension_numbers = #tpu.dot_dimension_numbers<[1], [0], [0], [1], [0, 0, 1, 1], [], []>} : vector<8x64xbf16>, vector<64x512xbf16>, vector<8x512xf32> -> vector<8x512xf32>
    %c24 = arith.constant 24 : index
    %c0_52 = arith.constant 0 : index
    %120 = vector.load %arg7[%c24, %c0_52] : memref<64x512xf32, #tpu.memory_space<vmem>>, vector<8x512xf32>
    %121 = arith.addf %120, %119 : vector<8x512xf32>
    %122 = vector.extract_strided_slice %121 {offsets = [0, 0], sizes = [8, 64], strides = [1, 1]} : vector<8x512xf32> to vector<8x64xf32>
    %cst_53 = arith.constant 5.000000e-01 : f32
    %123 = vector.broadcast %cst_53 : f32 to vector<8x64xf32>
    %124 = arith.mulf %123, %122 : vector<8x64xf32>
    %125 = math.tanh %124 : vector<8x64xf32>
    %cst_54 = arith.constant 1.000000e+00 : f32
    %126 = vector.broadcast %cst_54 : f32 to vector<8x64xf32>
    %127 = arith.addf %125, %126 : vector<8x64xf32>
    %cst_55 = arith.constant 5.000000e-01 : f32
    %128 = vector.broadcast %cst_55 : f32 to vector<8x64xf32>
    %129 = arith.mulf %128, %127 : vector<8x64xf32>
    %130 = vector.extract_strided_slice %121 {offsets = [0, 128], sizes = [8, 64], strides = [1, 1]} : vector<8x512xf32> to vector<8x64xf32>
    %cst_56 = arith.constant 5.000000e-01 : f32
    %131 = vector.broadcast %cst_56 : f32 to vector<8x64xf32>
    %132 = arith.mulf %131, %130 : vector<8x64xf32>
    %133 = math.tanh %132 : vector<8x64xf32>
    %cst_57 = arith.constant 1.000000e+00 : f32
    %134 = vector.broadcast %cst_57 : f32 to vector<8x64xf32>
    %135 = arith.addf %133, %134 : vector<8x64xf32>
    %cst_58 = arith.constant 5.000000e-01 : f32
    %136 = vector.broadcast %cst_58 : f32 to vector<8x64xf32>
    %137 = arith.mulf %136, %135 : vector<8x64xf32>
    %138 = vector.extract_strided_slice %121 {offsets = [0, 256], sizes = [8, 64], strides = [1, 1]} : vector<8x512xf32> to vector<8x64xf32>
    %139 = math.tanh %138 : vector<8x64xf32>
    %140 = vector.extract_strided_slice %121 {offsets = [0, 384], sizes = [8, 64], strides = [1, 1]} : vector<8x512xf32> to vector<8x64xf32>
    %cst_59 = arith.constant 5.000000e-01 : f32
    %141 = vector.broadcast %cst_59 : f32 to vector<8x64xf32>
    %142 = arith.mulf %141, %140 : vector<8x64xf32>
    %143 = math.tanh %142 : vector<8x64xf32>
    %cst_60 = arith.constant 1.000000e+00 : f32
    %144 = vector.broadcast %cst_60 : f32 to vector<8x64xf32>
    %145 = arith.addf %143, %144 : vector<8x64xf32>
    %cst_61 = arith.constant 5.000000e-01 : f32
    %146 = vector.broadcast %cst_61 : f32 to vector<8x64xf32>
    %147 = arith.mulf %146, %145 : vector<8x64xf32>
    %148 = arith.mulf %137, %114 : vector<8x64xf32>
    %149 = arith.mulf %129, %139 : vector<8x64xf32>
    %150 = arith.addf %148, %149 : vector<8x64xf32>
    %151 = math.tanh %150 : vector<8x64xf32>
    %152 = arith.mulf %147, %151 : vector<8x64xf32>
    %153 = arith.truncf %152 : vector<8x64xf32> to vector<8x64xbf16>
    %c0_62 = arith.constant 0 : index
    %c0_63 = arith.constant 0 : index
    %154 = vector.load %arg2[%c0_62, %c0_63] : memref<64x512xbf16, #tpu.memory_space<vmem>>, vector<64x512xbf16>
    %cst_64 = arith.constant dense<0.000000e+00> : vector<8x512xf32>
    %155 = tpu.matmul %153, %154, %cst_64 {dimension_numbers = #tpu.dot_dimension_numbers<[1], [0], [0], [1], [0, 0, 1, 1], [], []>} : vector<8x64xbf16>, vector<64x512xbf16>, vector<8x512xf32> -> vector<8x512xf32>
    %c32 = arith.constant 32 : index
    %c0_65 = arith.constant 0 : index
    %156 = vector.load %arg7[%c32, %c0_65] : memref<64x512xf32, #tpu.memory_space<vmem>>, vector<8x512xf32>
    %157 = arith.addf %156, %155 : vector<8x512xf32>
    %158 = vector.extract_strided_slice %157 {offsets = [0, 0], sizes = [8, 64], strides = [1, 1]} : vector<8x512xf32> to vector<8x64xf32>
    %cst_66 = arith.constant 5.000000e-01 : f32
    %159 = vector.broadcast %cst_66 : f32 to vector<8x64xf32>
    %160 = arith.mulf %159, %158 : vector<8x64xf32>
    %161 = math.tanh %160 : vector<8x64xf32>
    %cst_67 = arith.constant 1.000000e+00 : f32
    %162 = vector.broadcast %cst_67 : f32 to vector<8x64xf32>
    %163 = arith.addf %161, %162 : vector<8x64xf32>
    %cst_68 = arith.constant 5.000000e-01 : f32
    %164 = vector.broadcast %cst_68 : f32 to vector<8x64xf32>
    %165 = arith.mulf %164, %163 : vector<8x64xf32>
    %166 = vector.extract_strided_slice %157 {offsets = [0, 128], sizes = [8, 64], strides = [1, 1]} : vector<8x512xf32> to vector<8x64xf32>
    %cst_69 = arith.constant 5.000000e-01 : f32
    %167 = vector.broadcast %cst_69 : f32 to vector<8x64xf32>
    %168 = arith.mulf %167, %166 : vector<8x64xf32>
    %169 = math.tanh %168 : vector<8x64xf32>
    %cst_70 = arith.constant 1.000000e+00 : f32
    %170 = vector.broadcast %cst_70 : f32 to vector<8x64xf32>
    %171 = arith.addf %169, %170 : vector<8x64xf32>
    %cst_71 = arith.constant 5.000000e-01 : f32
    %172 = vector.broadcast %cst_71 : f32 to vector<8x64xf32>
    %173 = arith.mulf %172, %171 : vector<8x64xf32>
    %174 = vector.extract_strided_slice %157 {offsets = [0, 256], sizes = [8, 64], strides = [1, 1]} : vector<8x512xf32> to vector<8x64xf32>
    %175 = math.tanh %174 : vector<8x64xf32>
    %176 = vector.extract_strided_slice %157 {offsets = [0, 384], sizes = [8, 64], strides = [1, 1]} : vector<8x512xf32> to vector<8x64xf32>
    %cst_72 = arith.constant 5.000000e-01 : f32
    %177 = vector.broadcast %cst_72 : f32 to vector<8x64xf32>
    %178 = arith.mulf %177, %176 : vector<8x64xf32>
    %179 = math.tanh %178 : vector<8x64xf32>
    %cst_73 = arith.constant 1.000000e+00 : f32
    %180 = vector.broadcast %cst_73 : f32 to vector<8x64xf32>
    %181 = arith.addf %179, %180 : vector<8x64xf32>
    %cst_74 = arith.constant 5.000000e-01 : f32
    %182 = vector.broadcast %cst_74 : f32 to vector<8x64xf32>
    %183 = arith.mulf %182, %181 : vector<8x64xf32>
    %184 = arith.mulf %173, %150 : vector<8x64xf32>
    %185 = arith.mulf %165, %175 : vector<8x64xf32>
    %186 = arith.addf %184, %185 : vector<8x64xf32>
    %187 = math.tanh %186 : vector<8x64xf32>
    %188 = arith.mulf %183, %187 : vector<8x64xf32>
    %189 = arith.truncf %188 : vector<8x64xf32> to vector<8x64xbf16>
    %c0_75 = arith.constant 0 : index
    %c0_76 = arith.constant 0 : index
    %190 = vector.load %arg2[%c0_75, %c0_76] : memref<64x512xbf16, #tpu.memory_space<vmem>>, vector<64x512xbf16>
    %cst_77 = arith.constant dense<0.000000e+00> : vector<8x512xf32>
    %191 = tpu.matmul %189, %190, %cst_77 {dimension_numbers = #tpu.dot_dimension_numbers<[1], [0], [0], [1], [0, 0, 1, 1], [], []>} : vector<8x64xbf16>, vector<64x512xbf16>, vector<8x512xf32> -> vector<8x512xf32>
    %c40 = arith.constant 40 : index
    %c0_78 = arith.constant 0 : index
    %192 = vector.load %arg7[%c40, %c0_78] : memref<64x512xf32, #tpu.memory_space<vmem>>, vector<8x512xf32>
    %193 = arith.addf %192, %191 : vector<8x512xf32>
    %194 = vector.extract_strided_slice %193 {offsets = [0, 0], sizes = [8, 64], strides = [1, 1]} : vector<8x512xf32> to vector<8x64xf32>
    %cst_79 = arith.constant 5.000000e-01 : f32
    %195 = vector.broadcast %cst_79 : f32 to vector<8x64xf32>
    %196 = arith.mulf %195, %194 : vector<8x64xf32>
    %197 = math.tanh %196 : vector<8x64xf32>
    %cst_80 = arith.constant 1.000000e+00 : f32
    %198 = vector.broadcast %cst_80 : f32 to vector<8x64xf32>
    %199 = arith.addf %197, %198 : vector<8x64xf32>
    %cst_81 = arith.constant 5.000000e-01 : f32
    %200 = vector.broadcast %cst_81 : f32 to vector<8x64xf32>
    %201 = arith.mulf %200, %199 : vector<8x64xf32>
    %202 = vector.extract_strided_slice %193 {offsets = [0, 128], sizes = [8, 64], strides = [1, 1]} : vector<8x512xf32> to vector<8x64xf32>
    %cst_82 = arith.constant 5.000000e-01 : f32
    %203 = vector.broadcast %cst_82 : f32 to vector<8x64xf32>
    %204 = arith.mulf %203, %202 : vector<8x64xf32>
    %205 = math.tanh %204 : vector<8x64xf32>
    %cst_83 = arith.constant 1.000000e+00 : f32
    %206 = vector.broadcast %cst_83 : f32 to vector<8x64xf32>
    %207 = arith.addf %205, %206 : vector<8x64xf32>
    %cst_84 = arith.constant 5.000000e-01 : f32
    %208 = vector.broadcast %cst_84 : f32 to vector<8x64xf32>
    %209 = arith.mulf %208, %207 : vector<8x64xf32>
    %210 = vector.extract_strided_slice %193 {offsets = [0, 256], sizes = [8, 64], strides = [1, 1]} : vector<8x512xf32> to vector<8x64xf32>
    %211 = math.tanh %210 : vector<8x64xf32>
    %212 = vector.extract_strided_slice %193 {offsets = [0, 384], sizes = [8, 64], strides = [1, 1]} : vector<8x512xf32> to vector<8x64xf32>
    %cst_85 = arith.constant 5.000000e-01 : f32
    %213 = vector.broadcast %cst_85 : f32 to vector<8x64xf32>
    %214 = arith.mulf %213, %212 : vector<8x64xf32>
    %215 = math.tanh %214 : vector<8x64xf32>
    %cst_86 = arith.constant 1.000000e+00 : f32
    %216 = vector.broadcast %cst_86 : f32 to vector<8x64xf32>
    %217 = arith.addf %215, %216 : vector<8x64xf32>
    %cst_87 = arith.constant 5.000000e-01 : f32
    %218 = vector.broadcast %cst_87 : f32 to vector<8x64xf32>
    %219 = arith.mulf %218, %217 : vector<8x64xf32>
    %220 = arith.mulf %209, %186 : vector<8x64xf32>
    %221 = arith.mulf %201, %211 : vector<8x64xf32>
    %222 = arith.addf %220, %221 : vector<8x64xf32>
    %223 = math.tanh %222 : vector<8x64xf32>
    %224 = arith.mulf %219, %223 : vector<8x64xf32>
    %225 = arith.truncf %224 : vector<8x64xf32> to vector<8x64xbf16>
    %c0_88 = arith.constant 0 : index
    %c0_89 = arith.constant 0 : index
    %226 = vector.load %arg2[%c0_88, %c0_89] : memref<64x512xbf16, #tpu.memory_space<vmem>>, vector<64x512xbf16>
    %cst_90 = arith.constant dense<0.000000e+00> : vector<8x512xf32>
    %227 = tpu.matmul %225, %226, %cst_90 {dimension_numbers = #tpu.dot_dimension_numbers<[1], [0], [0], [1], [0, 0, 1, 1], [], []>} : vector<8x64xbf16>, vector<64x512xbf16>, vector<8x512xf32> -> vector<8x512xf32>
    %c48 = arith.constant 48 : index
    %c0_91 = arith.constant 0 : index
    %228 = vector.load %arg7[%c48, %c0_91] : memref<64x512xf32, #tpu.memory_space<vmem>>, vector<8x512xf32>
    %229 = arith.addf %228, %227 : vector<8x512xf32>
    %230 = vector.extract_strided_slice %229 {offsets = [0, 0], sizes = [8, 64], strides = [1, 1]} : vector<8x512xf32> to vector<8x64xf32>
    %cst_92 = arith.constant 5.000000e-01 : f32
    %231 = vector.broadcast %cst_92 : f32 to vector<8x64xf32>
    %232 = arith.mulf %231, %230 : vector<8x64xf32>
    %233 = math.tanh %232 : vector<8x64xf32>
    %cst_93 = arith.constant 1.000000e+00 : f32
    %234 = vector.broadcast %cst_93 : f32 to vector<8x64xf32>
    %235 = arith.addf %233, %234 : vector<8x64xf32>
    %cst_94 = arith.constant 5.000000e-01 : f32
    %236 = vector.broadcast %cst_94 : f32 to vector<8x64xf32>
    %237 = arith.mulf %236, %235 : vector<8x64xf32>
    %238 = vector.extract_strided_slice %229 {offsets = [0, 128], sizes = [8, 64], strides = [1, 1]} : vector<8x512xf32> to vector<8x64xf32>
    %cst_95 = arith.constant 5.000000e-01 : f32
    %239 = vector.broadcast %cst_95 : f32 to vector<8x64xf32>
    %240 = arith.mulf %239, %238 : vector<8x64xf32>
    %241 = math.tanh %240 : vector<8x64xf32>
    %cst_96 = arith.constant 1.000000e+00 : f32
    %242 = vector.broadcast %cst_96 : f32 to vector<8x64xf32>
    %243 = arith.addf %241, %242 : vector<8x64xf32>
    %cst_97 = arith.constant 5.000000e-01 : f32
    %244 = vector.broadcast %cst_97 : f32 to vector<8x64xf32>
    %245 = arith.mulf %244, %243 : vector<8x64xf32>
    %246 = vector.extract_strided_slice %229 {offsets = [0, 256], sizes = [8, 64], strides = [1, 1]} : vector<8x512xf32> to vector<8x64xf32>
    %247 = math.tanh %246 : vector<8x64xf32>
    %248 = vector.extract_strided_slice %229 {offsets = [0, 384], sizes = [8, 64], strides = [1, 1]} : vector<8x512xf32> to vector<8x64xf32>
    %cst_98 = arith.constant 5.000000e-01 : f32
    %249 = vector.broadcast %cst_98 : f32 to vector<8x64xf32>
    %250 = arith.mulf %249, %248 : vector<8x64xf32>
    %251 = math.tanh %250 : vector<8x64xf32>
    %cst_99 = arith.constant 1.000000e+00 : f32
    %252 = vector.broadcast %cst_99 : f32 to vector<8x64xf32>
    %253 = arith.addf %251, %252 : vector<8x64xf32>
    %cst_100 = arith.constant 5.000000e-01 : f32
    %254 = vector.broadcast %cst_100 : f32 to vector<8x64xf32>
    %255 = arith.mulf %254, %253 : vector<8x64xf32>
    %256 = arith.mulf %245, %222 : vector<8x64xf32>
    %257 = arith.mulf %237, %247 : vector<8x64xf32>
    %258 = arith.addf %256, %257 : vector<8x64xf32>
    %259 = math.tanh %258 : vector<8x64xf32>
    %260 = arith.mulf %255, %259 : vector<8x64xf32>
    %261 = arith.truncf %260 : vector<8x64xf32> to vector<8x64xbf16>
    %c0_101 = arith.constant 0 : index
    %c0_102 = arith.constant 0 : index
    %262 = vector.load %arg2[%c0_101, %c0_102] : memref<64x512xbf16, #tpu.memory_space<vmem>>, vector<64x512xbf16>
    %cst_103 = arith.constant dense<0.000000e+00> : vector<8x512xf32>
    %263 = tpu.matmul %261, %262, %cst_103 {dimension_numbers = #tpu.dot_dimension_numbers<[1], [0], [0], [1], [0, 0, 1, 1], [], []>} : vector<8x64xbf16>, vector<64x512xbf16>, vector<8x512xf32> -> vector<8x512xf32>
    %c56 = arith.constant 56 : index
    %c0_104 = arith.constant 0 : index
    %264 = vector.load %arg7[%c56, %c0_104] : memref<64x512xf32, #tpu.memory_space<vmem>>, vector<8x512xf32>
    %265 = arith.addf %264, %263 : vector<8x512xf32>
    %266 = vector.extract_strided_slice %265 {offsets = [0, 0], sizes = [8, 64], strides = [1, 1]} : vector<8x512xf32> to vector<8x64xf32>
    %cst_105 = arith.constant 5.000000e-01 : f32
    %267 = vector.broadcast %cst_105 : f32 to vector<8x64xf32>
    %268 = arith.mulf %267, %266 : vector<8x64xf32>
    %269 = math.tanh %268 : vector<8x64xf32>
    %cst_106 = arith.constant 1.000000e+00 : f32
    %270 = vector.broadcast %cst_106 : f32 to vector<8x64xf32>
    %271 = arith.addf %269, %270 : vector<8x64xf32>
    %cst_107 = arith.constant 5.000000e-01 : f32
    %272 = vector.broadcast %cst_107 : f32 to vector<8x64xf32>
    %273 = arith.mulf %272, %271 : vector<8x64xf32>
    %274 = vector.extract_strided_slice %265 {offsets = [0, 128], sizes = [8, 64], strides = [1, 1]} : vector<8x512xf32> to vector<8x64xf32>
    %cst_108 = arith.constant 5.000000e-01 : f32
    %275 = vector.broadcast %cst_108 : f32 to vector<8x64xf32>
    %276 = arith.mulf %275, %274 : vector<8x64xf32>
    %277 = math.tanh %276 : vector<8x64xf32>
    %cst_109 = arith.constant 1.000000e+00 : f32
    %278 = vector.broadcast %cst_109 : f32 to vector<8x64xf32>
    %279 = arith.addf %277, %278 : vector<8x64xf32>
    %cst_110 = arith.constant 5.000000e-01 : f32
    %280 = vector.broadcast %cst_110 : f32 to vector<8x64xf32>
    %281 = arith.mulf %280, %279 : vector<8x64xf32>
    %282 = vector.extract_strided_slice %265 {offsets = [0, 256], sizes = [8, 64], strides = [1, 1]} : vector<8x512xf32> to vector<8x64xf32>
    %283 = math.tanh %282 : vector<8x64xf32>
    %284 = vector.extract_strided_slice %265 {offsets = [0, 384], sizes = [8, 64], strides = [1, 1]} : vector<8x512xf32> to vector<8x64xf32>
    %cst_111 = arith.constant 5.000000e-01 : f32
    %285 = vector.broadcast %cst_111 : f32 to vector<8x64xf32>
    %286 = arith.mulf %285, %284 : vector<8x64xf32>
    %287 = math.tanh %286 : vector<8x64xf32>
    %cst_112 = arith.constant 1.000000e+00 : f32
    %288 = vector.broadcast %cst_112 : f32 to vector<8x64xf32>
    %289 = arith.addf %287, %288 : vector<8x64xf32>
    %cst_113 = arith.constant 5.000000e-01 : f32
    %290 = vector.broadcast %cst_113 : f32 to vector<8x64xf32>
    %291 = arith.mulf %290, %289 : vector<8x64xf32>
    %292 = arith.mulf %281, %258 : vector<8x64xf32>
    %293 = arith.mulf %273, %283 : vector<8x64xf32>
    %294 = arith.addf %292, %293 : vector<8x64xf32>
    %295 = math.tanh %294 : vector<8x64xf32>
    %296 = arith.mulf %291, %295 : vector<8x64xf32>
    %c0_114 = arith.constant 0 : index
    %c0_115 = arith.constant 0 : index
    %297 = vector.load %arg4[%c0_114, %c0_115] : memref<64x35xf32, #tpu.memory_space<vmem>>, vector<64x35xf32>
    %cst_116 = arith.constant dense<0.000000e+00> : vector<8x35xf32>
    %298 = tpu.matmul %296, %297, %cst_116 {dimension_numbers = #tpu.dot_dimension_numbers<[1], [0], [0], [1], [0, 0, 1, 1], [], []>} : vector<8x64xf32>, vector<64x35xf32>, vector<8x35xf32> -> vector<8x35xf32>
    %c0_117 = arith.constant 0 : index
    %c0_118 = arith.constant 0 : index
    %299 = vector.load %arg5[%c0_117, %c0_118] : memref<1x35xf32, #tpu.memory_space<vmem>>, vector<1x35xf32>
    %300 = vector.broadcast %299 : vector<1x35xf32> to vector<8x35xf32>
    %301 = arith.addf %298, %300 : vector<8x35xf32>
    %cst_119 = arith.constant 5.000000e-01 : f32
    %302 = vector.broadcast %cst_119 : f32 to vector<8x35xf32>
    %303 = arith.mulf %302, %301 : vector<8x35xf32>
    %304 = math.tanh %303 : vector<8x35xf32>
    %cst_120 = arith.constant 1.000000e+00 : f32
    %305 = vector.broadcast %cst_120 : f32 to vector<8x35xf32>
    %306 = arith.addf %304, %305 : vector<8x35xf32>
    %cst_121 = arith.constant 5.000000e-01 : f32
    %307 = vector.broadcast %cst_121 : f32 to vector<8x35xf32>
    %308 = arith.mulf %307, %306 : vector<8x35xf32>
    %c0_122 = arith.constant 0 : index
    %c0_123 = arith.constant 0 : index
    %309 = vector.load %arg6[%c0_122, %c0_123] : memref<8x35xf32, #tpu.memory_space<vmem>>, vector<8x35xf32>
    tpu.vector_store %arg6[%c0_122, %c0_123], %308 {strides = array<i32>} : memref<8x35xf32, #tpu.memory_space<vmem>>, vector<8x35xf32>,
    return
  }
}

</mosaic_0001>

<bundles_post_ra>
// kernel: tpu_custom_call.1
= control target key start
LH: loop header
LB: loop body
LE: loop exit
PB: predicated region body
PF: predicated region fallthrough
CT: control target
= control target key end

     0   :  { %11 = vsyncpa [#allocation4], 0  ;;  %s2262_s0 = inlined_call_operand.vmem [shape: bf16[64,36], index: 0, kind: input, shape index: {}]   ;;  %s2263_s1 = inlined_call_operand.hbm [shape: bf16[36,512], index: 1, kind: input, shape index: {}]   ;;  %s2264_s2 = inlined_call_operand.vmem [shape: bf16[64,512], index: 2, kind: input, shape index: {}]   ;;  %s2265_s3 = inlined_call_operand.hbm [shape: f32[1,512], index: 3, kind: input, shape index: {}]   ;;  %s2266_s4 = inlined_call_operand.vmem [shape: f32[64,35], index: 4, kind: input, shape index: {}]   ;;  %s2267_s5 = inlined_call_operand.vmem [shape: f32[1,35], index: 5, kind: input, shape index: {}]   ;;  %s2268_s6 = inlined_call_operand.hbm [shape: f32[8,35], index: 6, kind: output, shape index: {}]  }
   0x1   :  { %12 = vsyncpa [#allocation7], 0 }
   0x2   :  { %13 = vsyncpa [#allocation5], 0  ;;  %s1772_s21 = smov [#allocation3]   ;;  %s1700_s25 = scalar_lea.hbm %s2263_s1, 1280 }
   0x3   :  { %s21_s22 = sshll.u32 %s1772_s21, 4  ;;  %p1701_p0 = scmp.ne.s32.totalorder %s2263_s1, %s1700_s25  ;;  %s22_s22 = int_to_ptr.vmem [resolvable:$true] %s21_s22 }
   0x4   :  { %p1704_p1 = scmp.lt.u32.totalorder %s1700_s25, %s2263_s1 }
   0x6   :  { %p1706_p2 = pnand %p1704_p1, %p1701_p0 }
   0x8   :  { %1709 = shalt.err (!%p1706_p2)
}
   0x9   :  { %s1710_s30 = scalar_lea.vmem %s22_s22, 1280  ;;  %p1715_p4 = scmp.lt.s32.totalorder %s22_s22, %s22_s22 }
   0xa   :  { %p1711_p3 = scmp.ne.s32.totalorder %s22_s22, %s1710_s30  ;;  %p1716_p5 = scmp.lt.s32.totalorder %s1710_s30, %s1710_s30 }
   0xc   :  { %p1717_p6 = por %p1716_p5, %p1715_p4 }
   0xe   :  { %p1718_p7 = pnand %p1717_p6, %p1711_p3 }
  0x10   :  { %1721 = shalt.err (!%p1718_p7)
}
  0x11   :  { %s1773_s7 = smov 256   ;;  %s1774_s8 = smov 16  }
  0x12   :  { %27 = dma.hbm_to_vmem [thread:$0]  %s2263_s1, 1280, %s22_s22, [#allocation4], %s1773_s7, %s1773_s7, %s1774_s8  }
  0x13   :  { %s1775_s11 = smov [#allocation6]   ;;  %s1722_s15 = scalar_lea.hbm %s2265_s3, 64 }
  0x14   :  { %s36_s12 = sshll.u32 %s1775_s11, 4  ;;  %p1723_p8 = scmp.ne.s32.totalorder %s2265_s3, %s1722_s15  ;;  %s37_s12 = int_to_ptr.vmem [resolvable:$true] %s36_s12 }
  0x15   :  { %p1726_p9 = scmp.lt.u32.totalorder %s1722_s15, %s2265_s3 }
  0x17   :  { %p1728_p10 = pnand %p1726_p9, %p1723_p8 }
  0x19   :  { %1731 = shalt.err (!%p1728_p10)
}
  0x1a   :  { %s1732_s20 = scalar_lea.vmem %s37_s12, 64  ;;  %p1737_p12 = scmp.lt.s32.totalorder %s37_s12, %s37_s12 }
  0x1b   :  { %p1733_p11 = scmp.ne.s32.totalorder %s37_s12, %s1732_s20  ;;  %p1738_p13 = scmp.lt.s32.totalorder %s1732_s20, %s1732_s20 }
  0x1d   :  { %p1739_p0 = por %p1738_p13, %p1737_p12 }
  0x1f   :  { %p1740_p1 = pnand %p1739_p0, %p1733_p11 }
  0x21   :  { %1743 = shalt.err (!%p1740_p1)
}
  0x22   :  { %39 = dma.hbm_to_vmem [thread:$0]  %s2265_s3, 64, %s37_s12, [#allocation7]  }
  0x23   :  { %1766 = dma.done.wait [#allocation4], 1280  }
  0x24   :  { %1767 = vsyncadd [#allocation4], 4294966016 }
  0x25   :  { %1768 = dma.done.wait [#allocation7], 64  }
  0x26   :  { %1769 = vsyncadd [#allocation7], 4294967232  ;;  %v2269_v0 = vmov 0   ;;  %v1574_v1 = vld [vmem:[#allocation3 + $0x4] ss:$16 sps:$4 sm:$0xff]   ;;  %vm174_vm0 = vcmask 1041408   ;;  %v71_v37 = vlaneseq }
  0x27   :  { %219 = vmatprep.mubr.bf16.mxu0 %v2269_v0  ;;  %292 = vmatprep.mubr.bf16.mxu1 %v2269_v0  ;;  %v1576_v2 = vld [vmem:[#allocation3 + $0xc] ss:$16 sps:$4 sm:$0xff]   ;;  %v1578_v3 = vld [vmem:[#allocation3] ss:$16 sps:$4 sm:$0xff]   ;;  %v1579_v4 = vld [vmem:[#allocation3 + $0x8] ss:$16 sps:$4 sm:$0xff]  }
  0x28   :  { %187 = vmatprep.subr.bf16.mxu0 %v1574_v1  ;;  %260 = vmatprep.subr.bf16.mxu1 %v1576_v2  ;;  %v1580_v5 = vld [vmem:[#allocation3 + $0x24] ss:$16 sps:$4 sm:$0xff]   ;;  %v1582_v6 = vld [vmem:[#allocation3 + $0x2c] ss:$16 sps:$4 sm:$0xff]   ;;  %v1584_v7 = vld [vmem:[#allocation3 + $0x20] ss:$16 sps:$4 sm:$0xff]  }
  0x29   :  { %188 = vmatpush1.bf16.msra.mxu0 %v1578_v3  ;;  %261 = vmatpush1.bf16.msra.mxu1 %v1579_v4  ;;  %v1585_v8 = vld [vmem:[#allocation3 + $0x28] ss:$16 sps:$4 sm:$0xff]   ;;  %v67_v9 = vld [vmem:[#allocation3 + $0x40] sm:$0x33]  ;;  %v1847_v17 = vld [vmem:[%s2264_s2 + $0x4] ss:$16 sps:$4 sm:$0xff]  }
  0x2a   :  { %189 = vmatprep.subr.bf16.mxu0 %v1580_v5  ;;  %v68_v10 = vld [vmem:[#allocation3 + $0x48] sm:$0x33]  ;;  %262 = vmatprep.subr.bf16.mxu1 %v1582_v6  ;;  %v1480_v11 = vcombine.high %v67_v9, %v67_v9  ;;  %v1479_v13 = vcombine.low %v67_v9, %v67_v9  ;;  %v1854_v18 = vld [vmem:[%s2264_s2 + $0xc] ss:$16 sps:$4 sm:$0xff]   ;;  %v1590_v19 = vld [vmem:[%s2262_s0] sm:$0xff]   ;;  %vm161_vm1 = vcmask 293888  }
  0x2b   :  { %v1482_v12 = vcombine.high %v68_v10, %v68_v10  ;;  %v1481_v14 = vcombine.low %v68_v10, %v68_v10  ;;  %v1862_v20 = vld [vmem:[%s2264_s2] ss:$16 sps:$4 sm:$0xff]   ;;  %v1869_v21 = vld [vmem:[%s2264_s2 + $0x24] ss:$16 sps:$4 sm:$0xff]   ;;  %v1874_v22 = vld [vmem:[%s2264_s2 + $0x8] ss:$16 sps:$4 sm:$0xff]  }
  0x2c   :  { %v176_v15 = vsel %vm174_vm0, %v1479_v13, 0  ;;  %v1881_v23 = vld [vmem:[%s2264_s2 + $0x2c] ss:$16 sps:$4 sm:$0xff]   ;;  %v1888_v24 = vld [vmem:[%s2264_s2 + $0x20] ss:$16 sps:$4 sm:$0xff]   ;;  %v72_v38 = vshrl.u32 %v71_v37, 7 }
  0x2d   :  { %190 = vmatpush1.bf16.msra.mxu0 %v1584_v7  ;;  %263 = vmatpush1.bf16.msra.mxu1 %v1585_v8  ;;  %v182_v16 = vsel %vm174_vm0, %v1481_v14, 0  ;;  %v1895_v25 = vld [vmem:[%s2264_s2 + $0x44] ss:$16 sps:$4 sm:$0xff]   ;;  %v1901_v26 = vld [vmem:[%s2264_s2 + $0x28] ss:$16 sps:$4 sm:$0xff]   ;;  %vm461_vm2 = vcmask 523264  }
  0x2e   :  { %1483 = vmatprep.subr.msk.bf16.mxu0 %vm174_vm0, %v1480_v11  ;;  %1488 = vmatprep.subr.msk.bf16.mxu1 %vm174_vm0, %v1482_v12  ;;  %v1596_v27 = vld [vmem:[%s2262_s0 + $0x8] sm:$0xff]   ;;  %v1912_v28 = vld [vmem:[%s2264_s2 + $0x40] ss:$16 sps:$4 sm:$0xff]   ;;  %v1923_v30 = vld [vmem:[%s2264_s2 + $0x64] ss:$16 sps:$4 sm:$0xff]   ;;  %v81_v39 = vsub.s32 2, %v72_v38 }
  0x2f   :  { %v1917_v29 = vld [vmem:[%s2264_s2 + $0x4c] ss:$16 sps:$4 sm:$0xff]   ;;  %v1928_v31 = vld [vmem:[%s2264_s2 + $0x48] ss:$16 sps:$4 sm:$0xff]   ;;  %v1944_v33 = vld [vmem:[%s2264_s2 + $0x60] ss:$16 sps:$4 sm:$0xff]  }
  0x30   :  { %v1935_v32 = vld [vmem:[%s2264_s2 + $0x6c] ss:$16 sps:$4 sm:$0xff]   ;;  %v1951_v34 = vld [vmem:[%s2264_s2 + $0x68] ss:$16 sps:$4 sm:$0xff]   ;;  %v1603_v35 = vld [vmem:[%s2262_s0 + $0x10] sm:$0xff]   ;;  %v85_v40 = vsub.s32 3, %v72_v38 }
  0x31   :  { %192 = vmatpush1.bf16.msra.mxu0 %v176_v15  ;;  %265 = vmatpush1.bf16.msra.mxu1 %v182_v16  ;;  %v1610_v36 = vld [vmem:[%s2262_s0 + $0x18] sm:$0xff]   ;;  %v73_v41 = vsub.s32 0, %v72_v38  ;;  %v77_v43 = vsub.s32 1, %v72_v38  ;;  %vm1778_vm3 = vmmov 0   ;;  %s1780_s24 = smov [#allocation8]   ;;  %vm1449_vm4 = vcmask 285696  }
  0x32   :  { %465 = vmatprep.subr.bf16.mxu0 %v1847_v17  ;;  %506 = vmatprep.subr.bf16.mxu1 %v1854_v18  ;;  %v69_v42 = vld [vmem:[#allocation6] sm:$0xf]  ;;  %s1457_s25 = sshll.u32 %s1780_s24, 4  ;;  %s1458_s25 = int_to_ptr.vmem [resolvable:$true] %s1457_s25 }
  0x33   :  { %v1992_v44 = vrot.slane %v69_v42, %v81_v39  ;;  %v1998_v47 = vrot.slane %v69_v42, %v85_v40  ;;  %v74_v48 = vrot.slane %v69_v42, %v73_v41  ;;  %v78_v51 = vrot.slane %v69_v42, %v77_v43  ;;  %s1744_s26 = scalar_lea.vmem %s1458_s25, 128  ;;  %p1749_p3 = scmp.lt.s32.totalorder %s1458_s25, %s1458_s25 }
  0x34   :  { %1484 = vmatmul.mubr.msk.bf16.vlgmr.msra.gmra.mrb[0].mxu0 %vm161_vm1, %v1590_v19  ;;  %1489 = vmatmul.mubr.msk.bf16.vlgmr.msra.gmra.mrb[0].mxu1 %vm161_vm1, %v1590_v19  ;;  %p1745_p2 = scmp.ne.s32.totalorder %s1458_s25, %s1744_s26  ;;  %p1750_p4 = scmp.lt.s32.totalorder %s1744_s26, %s1744_s26 }
  0x35   :  { %466 = vmatpush1.bf16.msra.mxu0 %v1862_v20  ;;  %229 = vmatprep.mubr.bf16.mxu0 %v2269_v0 }
  0x36   :  { %302 = vmatprep.mubr.bf16.mxu1 %v2269_v0  ;;  %467 = vmatprep.subr.bf16.mxu0 %v1869_v21  ;;  %p1751_p5 = por %p1750_p4, %p1749_p3 }
  0x37   :  { %507 = vmatpush1.bf16.msra.mxu1 %v1874_v22 }
  0x38   :  { %508 = vmatprep.subr.bf16.mxu1 %v1881_v23  ;;  %p1752_p6 = pnand %p1751_p5, %p1745_p2 }
  0x39   :  { %468 = vmatpush1.bf16.msra.mxu0 %v1888_v24 }
  0x3a   :  { %469 = vmatprep.subr.bf16.mxu0 %v1895_v25 }
  0x3b   :  { %509 = vmatpush1.bf16.msra.mxu1 %v1901_v26 }
  0x3c   :  { %1485 = vmatmul.mubr.msk.bf16.gmra.mrb[4].mxu0 %vm161_vm1, %v1596_v27  ;;  %1490 = vmatmul.mubr.msk.bf16.gmra.mrb[4].mxu1 %vm161_vm1, %v1596_v27 }
  0x3d   :  { %239 = vmatprep.mubr.bf16.mxu0 %v2269_v0  ;;  %312 = vmatprep.mubr.bf16.mxu1 %v2269_v0 }
  0x3e   :  { %470 = vmatpush1.bf16.msra.mxu0 %v1912_v28  ;;  %510 = vmatprep.subr.bf16.mxu1 %v1917_v29 }
  0x3f   :  { %471 = vmatprep.subr.bf16.mxu0 %v1923_v30  ;;  %511 = vmatpush1.bf16.msra.mxu1 %v1928_v31 }
  0x40   :  { %512 = vmatprep.subr.bf16.mxu1 %v1935_v32 }
  0x42   :  { %472 = vmatpush1.bf16.msra.mxu0 %v1944_v33 }
  0x43   :  { %513 = vmatpush1.bf16.msra.mxu1 %v1951_v34  ;;  %577 = vmatprep.subr.bf16.mxu0 %v1847_v17 }
  0x44   :  { %1486 = vmatmul.mubr.msk.bf16.gmra.mrb[8].mxu0 %vm161_vm1, %v1603_v35  ;;  %1491 = vmatmul.mubr.msk.bf16.gmra.mrb[8].mxu1 %vm161_vm1, %v1603_v35 }
  0x45   :  { %249 = vmatprep.mubr.bf16.mxu0 %v2269_v0  ;;  %322 = vmatprep.mubr.bf16.mxu1 %v2269_v0 }
  0x46   :  { %618 = vmatprep.subr.bf16.mxu1 %v1854_v18 }
  0x4c   :  { %1487 = vmatmul.mubr.msk.bf16.gmra.mrb[12].mxu0 %vm161_vm1, %v1610_v36  ;;  %1492 = vmatmul.mubr.msk.bf16.gmra.mrb[12].mxu1 %vm161_vm1, %v1610_v36 }
  0x4d   :  { %497 = vmatprep.mubr.bf16.mxu0 %v2269_v0  ;;  %538 = vmatprep.mubr.bf16.mxu1 %v2269_v0 }
  0x54   :  { %498 = vmatmul.mubr.bf16.vlgmr.msra.gmra.mrb[16].mxu0 %v2269_v0  ;;  %539 = vmatmul.mubr.bf16.vlgmr.msra.gmra.mrb[16].mxu1 %v2269_v0 }
  0x55   :  { %578 = vmatpush1.bf16.msra.mxu0 %v1862_v20  ;;  %619 = vmatpush1.bf16.msra.mxu1 %v1874_v22 }
  0x56   :  { %579 = vmatprep.subr.bf16.mxu0 %v1869_v21  ;;  %620 = vmatprep.subr.bf16.mxu1 %v1881_v23 }
  0x57   :  { %609 = vmatprep.mubr.bf16.mxu0 %v2269_v0  ;;  %650 = vmatprep.mubr.bf16.mxu1 %v2269_v0 }
  0x59   :  { %580 = vmatpush1.bf16.msra.mxu0 %v1888_v24  ;;  %621 = vmatpush1.bf16.msra.mxu1 %v1901_v26 }
  0x5a   :  { %581 = vmatprep.subr.bf16.mxu0 %v1895_v25  ;;  %622 = vmatprep.subr.bf16.mxu1 %v1917_v29 }
  0x5d   :  { %582 = vmatpush1.bf16.msra.mxu0 %v1912_v28  ;;  %623 = vmatpush1.bf16.msra.mxu1 %v1928_v31 }
  0x5e   :  { %583 = vmatprep.subr.bf16.mxu0 %v1923_v30  ;;  %624 = vmatprep.subr.bf16.mxu1 %v1935_v32 }
  0x61   :  { %584 = vmatpush1.bf16.msra.mxu0 %v1944_v33  ;;  %625 = vmatpush1.bf16.msra.mxu1 %v1951_v34 }
  0x62   :  { %689 = vmatprep.subr.bf16.mxu0 %v1847_v17  ;;  %730 = vmatprep.subr.bf16.mxu1 %v1854_v18 }
 0x107   :  { %v1994_v45 = vpop.f32.mrb[0].mxu0  ;;  %v1996_v46 = vpop.f32.mrb[0].mxu1 }
 0x108   :  { %v223_v49 = vpop.f32.mrb[1].mxu0  ;;  %v296_v50 = vpop.f32.mrb[1].mxu1 }
 0x109   :  { %v225_v52 = vpop.f32.mrb[2].mxu0  ;;  %v298_v53 = vpop.f32.mrb[2].mxu1 }
 0x10a   :  { %v2000_v54 = vadd.f32 %v225_v52, %v74_v48  ;;  %v227_v55 = vpop.f32.mrb[3].mxu0  ;;  %v2003_v56 = vadd.f32 %v298_v53, %v1992_v44  ;;  %v300_v57 = vpop.f32.mrb[3].mxu1 }
 0x10b   :  { %v2005_v58 = vadd.f32 %v227_v55, %v78_v51  ;;  %v2008_v59 = vadd.f32 %v300_v57, %v1998_v47 }
 0x10f   :  { %v231_v60 = vpop.f32.mrb[4].mxu0  ;;  %v304_v61 = vpop.f32.mrb[4].mxu1 }
 0x110   :  { %v2010_v62 = vadd.f32 %v231_v60, %v74_v48  ;;  %v233_v63 = vpop.f32.mrb[5].mxu0  ;;  %v2013_v1 = vadd.f32 %v304_v61, %v1992_v44  ;;  %v306_v2 = vpop.f32.mrb[5].mxu1 }
 0x111   :  { %v2015_v3 = vadd.f32 %v233_v63, %v78_v51  ;;  %v235_v4 = vpop.f32.mrb[6].mxu0  ;;  %v2018_v5 = vadd.f32 %v306_v2, %v1998_v47  ;;  %v308_v6 = vpop.f32.mrb[6].mxu1 }
 0x112   :  { %v2020_v7 = vadd.f32 %v235_v4, %v74_v48  ;;  %v237_v8 = vpop.f32.mrb[7].mxu0  ;;  %v2023_v9 = vadd.f32 %v308_v6, %v1992_v44  ;;  %v310_v10 = vpop.f32.mrb[7].mxu1 }
 0x113   :  { %v2025_v11 = vadd.f32 %v237_v8, %v78_v51  ;;  %v2028_v12 = vadd.f32 %v310_v10, %v1998_v47 }
 0x117   :  { %v241_v13 = vpop.f32.mrb[8].mxu0  ;;  %v314_v14 = vpop.f32.mrb[8].mxu1 }
 0x118   :  { %v2030_v15 = vadd.f32 %v241_v13, %v74_v48  ;;  %v243_v16 = vpop.f32.mrb[9].mxu0  ;;  %v2033_v19 = vadd.f32 %v314_v14, %v1992_v44  ;;  %v316_v27 = vpop.f32.mrb[9].mxu1 }
 0x119   :  { %v2035_v35 = vadd.f32 %v243_v16, %v78_v51  ;;  %v245_v36 = vpop.f32.mrb[10].mxu0  ;;  %v2038_v37 = vadd.f32 %v316_v27, %v1998_v47  ;;  %v318_v38 = vpop.f32.mrb[10].mxu1 }
 0x11a   :  { %v2040_v39 = vadd.f32 %v245_v36, %v74_v48  ;;  %v247_v40 = vpop.f32.mrb[11].mxu0  ;;  %v2043_v41 = vadd.f32 %v318_v38, %v1992_v44  ;;  %v320_v42 = vpop.f32.mrb[11].mxu1  ;;  %v222_v38 = vadd.f32 %v1994_v45, %v74_v48 }
 0x11b   :  { %v2045_v43 = vadd.f32 %v247_v40, %v78_v51  ;;  %v2048_v52 = vadd.f32 %v320_v42, %v1998_v47  ;;  %v295_v40 = vadd.f32 %v1996_v46, %v1992_v44  ;;  %v224_v42 = vadd.f32 %v223_v49, %v78_v51 }
 0x11f   :  { %v251_v53 = vpop.f32.mrb[12].mxu0  ;;  %v324_v55 = vpop.f32.mrb[12].mxu1 }
 0x120   :  { %v2050_v57 = vadd.f32 %v251_v53, %v74_v48  ;;  %v253_v60 = vpop.f32.mrb[13].mxu0  ;;  %v2053_v61 = vadd.f32 %v324_v55, %v1992_v44  ;;  %v326_v63 = vpop.f32.mrb[13].mxu1  ;;  %v297_v53 = vadd.f32 %v296_v50, %v1998_v47 }
 0x121   :  { %v2055_v2 = vadd.f32 %v253_v60, %v78_v51  ;;  %v255_v4 = vpop.f32.mrb[14].mxu0  ;;  %v2058_v6 = vadd.f32 %v326_v63, %v1998_v47  ;;  %v328_v8 = vpop.f32.mrb[14].mxu1 }
 0x122   :  { %v2060_v10 = vadd.f32 %v255_v4, %v74_v48  ;;  %v257_v13 = vpop.f32.mrb[15].mxu0  ;;  %v2063_v14 = vadd.f32 %v328_v8, %v1992_v44  ;;  %v330_v16 = vpop.f32.mrb[15].mxu1 }
 0x123   :  { %2271 = vst [vmem:[#allocation12_spill] sm:$0xff] %v2058_v6  ;;  %v2065_v27 = vadd.f32 %v257_v13, %v78_v51  ;;  %v2068_v36 = vadd.f32 %v330_v16, %v1998_v47 }
 0x124   :  { %2272 = vst [vmem:[#allocation13_spill] sm:$0xff] %v2060_v10  ;;  %2273 = vst [vmem:[#allocation14_spill] sm:$0xff] %v2063_v14 }
 0x125   :  { %2274 = vst [vmem:[#allocation15_spill] sm:$0xff] %v2065_v27  ;;  %2275 = vst [vmem:[#allocation16_spill] sm:$0xff] %v2068_v36 }
 0x127   :  { %v499_v55 = vpop.f32.mrb[16].mxu0  ;;  %v540_v60 = vpop.f32.mrb[16].mxu1 }
 0x128   :  { %v551_v63 = vadd.f32 %v499_v55, %v222_v38  ;;  %v553_v4 = vadd.f32 %v540_v60, %v295_v40  ;;  %v501_v8 = vpop.f32.mrb[17].mxu0  ;;  %v542_v0 = vpop.f32.mrb[17].mxu1  ;;  %v2276_v55 = vmov 0  }
 0x129   :  { %v552_v14 = vadd.f32 %v501_v8, %v224_v42  ;;  %v554_v13 = vadd.f32 %v542_v0, %v297_v53  ;;  %v503_v27 = vpop.f32.mrb[18].mxu0  ;;  %v544_v10 = vpop.f32.mrb[18].mxu1 }
 0x12a   :  { %v555_v16 = vmul.f32 0.5, %v551_v63  ;;  %v504_v36 = vpop.f32.mrb[19].mxu0  ;;  %v545_v6 = vpop.f32.mrb[19].mxu1 }
 0x12b   :  { %v559_v45 = vmul.f32 0.5, %v552_v14  ;;  %v564_v44 = vmul.f32 0.5, %v554_v13 }
 0x12c   :  { %1618 = vtanh.f32 %v555_v16 }
 0x12d   :  { %1620 = vtanh.f32 %v559_v45 }
 0x12e   :  { %1622 = vtanh.f32 %v553_v4 }
 0x12f   :  { %1624 = vtanh.f32 %v564_v44 }
 0x136   :  { %v1619_v46 = vpop.eup %1618 }
 0x137   :  { %v1621_v47 = vpop.eup %1620  ;;  %v557_v48 = vadd.f32 1.0, %v1619_v46 }
 0x138   :  { %v561_v49 = vadd.f32 1.0, %v1621_v47  ;;  %v1623_v51 = vpop.eup %1622 }
 0x139   :  { %v558_v50 = vmul.f32 0.5, %v557_v48  ;;  %v1625_v10 = vpop.eup %1624 }
 0x13a   :  { %v562_v38 = vmul.f32 0.5, %v561_v49  ;;  %v566_v36 = vadd.f32 1.0, %v1625_v10 }
 0x13b   :  { %v569_v40 = vmul.f32 %v1623_v51, %v558_v50 }
 0x13c   :  { %v568_v0 = vmul.f32 0.0, %v562_v38  ;;  %v567_v6 = vmul.f32 0.5, %v566_v36 }
 0x13e   :  { %v570_v27 = vadd.f32 %v569_v40, %v568_v0 }
 0x140   :  { %1626 = vtanh.f32 %v570_v27 }
 0x14a   :  { %v1627_v14 = vpop.eup %1626 }
 0x14b   :  { %v572_v42 = vmul.f32 %v1627_v14, %v567_v6 }
 0x14d   :  { %v573_v53 = vpack.c.bf16 %v572_v42, %v572_v42 }
 0x14f   :  { %1509 = vmatmul.mubr.msk.bf16.vlgmr.msra.gmra.mrb[20].mxu0 %vm461_vm2, %v573_v53  ;;  %1510 = vmatmul.mubr.msk.bf16.vlgmr.msra.gmra.mrb[20].mxu1 %vm461_vm2, %v573_v53 }
 0x150   :  { %690 = vmatpush1.bf16.msra.mxu0 %v1862_v20  ;;  %731 = vmatpush1.bf16.msra.mxu1 %v1874_v22 }
 0x151   :  { %691 = vmatprep.subr.bf16.mxu0 %v1869_v21  ;;  %732 = vmatprep.subr.bf16.mxu1 %v1881_v23 }
 0x152   :  { %721 = vmatprep.mubr.bf16.mxu0 %v2276_v55  ;;  %762 = vmatprep.mubr.bf16.mxu1 %v2276_v55 }
 0x154   :  { %692 = vmatpush1.bf16.msra.mxu0 %v1888_v24  ;;  %733 = vmatpush1.bf16.msra.mxu1 %v1901_v26 }
 0x155   :  { %693 = vmatprep.subr.bf16.mxu0 %v1895_v25  ;;  %734 = vmatprep.subr.bf16.mxu1 %v1917_v29 }
 0x158   :  { %694 = vmatpush1.bf16.msra.mxu0 %v1912_v28  ;;  %735 = vmatpush1.bf16.msra.mxu1 %v1928_v31 }
 0x159   :  { %695 = vmatprep.subr.bf16.mxu0 %v1923_v30  ;;  %736 = vmatprep.subr.bf16.mxu1 %v1935_v32 }
 0x15c   :  { %696 = vmatpush1.bf16.msra.mxu0 %v1944_v33  ;;  %737 = vmatpush1.bf16.msra.mxu1 %v1951_v34 }
 0x15d   :  { %801 = vmatprep.subr.bf16.mxu0 %v1847_v17  ;;  %842 = vmatprep.subr.bf16.mxu1 %v1854_v18 }
 0x222   :  { %v611_v60 = vpop.f32.mrb[20].mxu0  ;;  %v652_v63 = vpop.f32.mrb[20].mxu1 }
 0x223   :  { %v663_v4 = vadd.f32 %v611_v60, %v2000_v54  ;;  %v665_v8 = vadd.f32 %v652_v63, %v2003_v56  ;;  %v613_v13 = vpop.f32.mrb[21].mxu0  ;;  %v654_v16 = vpop.f32.mrb[21].mxu1 }
 0x224   :  { %v664_v45 = vadd.f32 %v613_v13, %v2005_v58  ;;  %v666_v44 = vadd.f32 %v654_v16, %v2008_v59  ;;  %v615_v46 = vpop.f32.mrb[22].mxu0  ;;  %v656_v47 = vpop.f32.mrb[22].mxu1 }
 0x225   :  { %v667_v48 = vmul.f32 0.5, %v663_v4  ;;  %v616_v49 = vpop.f32.mrb[23].mxu0  ;;  %v657_v50 = vpop.f32.mrb[23].mxu1 }
 0x226   :  { %v671_v51 = vmul.f32 0.5, %v664_v45  ;;  %v676_v38 = vmul.f32 0.5, %v666_v44 }
 0x227   :  { %1628 = vtanh.f32 %v667_v48 }
 0x228   :  { %1630 = vtanh.f32 %v671_v51 }
 0x229   :  { %1632 = vtanh.f32 %v665_v8 }
 0x22a   :  { %1634 = vtanh.f32 %v676_v38 }
 0x231   :  { %v1629_v40 = vpop.eup %1628 }
 0x232   :  { %v1631_v54 = vpop.eup %1630  ;;  %v669_v0 = vadd.f32 1.0, %v1629_v40 }
 0x233   :  { %v673_v56 = vadd.f32 1.0, %v1631_v54  ;;  %v1633_v36 = vpop.eup %1632 }
 0x234   :  { %v670_v10 = vmul.f32 0.5, %v669_v0  ;;  %v1635_v42 = vpop.eup %1634 }
 0x235   :  { %v674_v58 = vmul.f32 0.5, %v673_v56  ;;  %v678_v53 = vadd.f32 1.0, %v1635_v42 }
 0x236   :  { %v681_v6 = vmul.f32 %v1633_v36, %v670_v10 }
 0x237   :  { %v680_v59 = vmul.f32 %v674_v58, %v570_v27  ;;  %v679_v60 = vmul.f32 0.5, %v678_v53 }
 0x239   :  { %v682_v14 = vadd.f32 %v681_v6, %v680_v59 }
 0x23b   :  { %1636 = vtanh.f32 %v682_v14 }
 0x245   :  { %v1637_v63 = vpop.eup %1636 }
 0x246   :  { %v684_v4 = vmul.f32 %v1637_v63, %v679_v60 }
 0x248   :  { %v685_v13 = vpack.c.bf16 %v684_v4, %v684_v4 }
 0x24a   :  { %1511 = vmatmul.mubr.msk.bf16.vlgmr.msra.gmra.mrb[24].mxu0 %vm461_vm2, %v685_v13  ;;  %1512 = vmatmul.mubr.msk.bf16.vlgmr.msra.gmra.mrb[24].mxu1 %vm461_vm2, %v685_v13 }
 0x24b   :  { %802 = vmatpush1.bf16.msra.mxu0 %v1862_v20  ;;  %843 = vmatpush1.bf16.msra.mxu1 %v1874_v22 }
 0x24c   :  { %803 = vmatprep.subr.bf16.mxu0 %v1869_v21  ;;  %844 = vmatprep.subr.bf16.mxu1 %v1881_v23 }
 0x24d   :  { %833 = vmatprep.mubr.bf16.mxu0 %v2276_v55  ;;  %874 = vmatprep.mubr.bf16.mxu1 %v2276_v55 }
 0x24f   :  { %804 = vmatpush1.bf16.msra.mxu0 %v1888_v24  ;;  %845 = vmatpush1.bf16.msra.mxu1 %v1901_v26 }
 0x250   :  { %805 = vmatprep.subr.bf16.mxu0 %v1895_v25  ;;  %846 = vmatprep.subr.bf16.mxu1 %v1917_v29 }
 0x253   :  { %806 = vmatpush1.bf16.msra.mxu0 %v1912_v28  ;;  %847 = vmatpush1.bf16.msra.mxu1 %v1928_v31 }
 0x254   :  { %807 = vmatprep.subr.bf16.mxu0 %v1923_v30  ;;  %848 = vmatprep.subr.bf16.mxu1 %v1935_v32 }
 0x257   :  { %808 = vmatpush1.bf16.msra.mxu0 %v1944_v33  ;;  %849 = vmatpush1.bf16.msra.mxu1 %v1951_v34 }
 0x258   :  { %913 = vmatprep.subr.bf16.mxu0 %v1847_v17  ;;  %954 = vmatprep.subr.bf16.mxu1 %v1854_v18 }
 0x31d   :  { %v723_v27 = vpop.f32.mrb[24].mxu0  ;;  %v764_v8 = vpop.f32.mrb[24].mxu1 }
 0x31e   :  { %v775_v16 = vadd.f32 %v723_v27, %v2010_v62  ;;  %v777_v45 = vadd.f32 %v764_v8, %v2013_v1  ;;  %v725_v44 = vpop.f32.mrb[25].mxu0  ;;  %v766_v46 = vpop.f32.mrb[25].mxu1 }
 0x31f   :  { %v776_v47 = vadd.f32 %v725_v44, %v2015_v3  ;;  %v778_v48 = vadd.f32 %v766_v46, %v2018_v5  ;;  %v727_v49 = vpop.f32.mrb[26].mxu0  ;;  %v768_v50 = vpop.f32.mrb[26].mxu1 }
 0x320   :  { %v779_v51 = vmul.f32 0.5, %v775_v16  ;;  %v728_v38 = vpop.f32.mrb[27].mxu0  ;;  %v769_v40 = vpop.f32.mrb[27].mxu1 }
 0x321   :  { %v783_v54 = vmul.f32 0.5, %v776_v47  ;;  %v788_v0 = vmul.f32 0.5, %v778_v48 }
 0x322   :  { %1638 = vtanh.f32 %v779_v51 }
 0x323   :  { %1640 = vtanh.f32 %v783_v54 }
 0x324   :  { %1642 = vtanh.f32 %v777_v45 }
 0x325   :  { %1644 = vtanh.f32 %v788_v0 }
 0x32c   :  { %v1639_v56 = vpop.eup %1638 }
 0x32d   :  { %v1641_v62 = vpop.eup %1640  ;;  %v781_v10 = vadd.f32 1.0, %v1639_v56 }
 0x32e   :  { %v785_v1 = vadd.f32 1.0, %v1641_v62  ;;  %v1643_v58 = vpop.eup %1642 }
 0x32f   :  { %v782_v36 = vmul.f32 0.5, %v781_v10  ;;  %v1645_v42 = vpop.eup %1644 }
 0x330   :  { %v786_v3 = vmul.f32 0.5, %v785_v1  ;;  %v790_v53 = vadd.f32 1.0, %v1645_v42 }
 0x331   :  { %v793_v6 = vmul.f32 %v1643_v58, %v782_v36 }
 0x332   :  { %v792_v5 = vmul.f32 %v786_v3, %v682_v14  ;;  %v791_v60 = vmul.f32 0.5, %v790_v53 }
 0x334   :  { %v794_v59 = vadd.f32 %v793_v6, %v792_v5 }
 0x336   :  { %1646 = vtanh.f32 %v794_v59 }
 0x340   :  { %v1647_v63 = vpop.eup %1646 }
 0x341   :  { %v796_v4 = vmul.f32 %v1647_v63, %v791_v60 }
 0x343   :  { %v797_v13 = vpack.c.bf16 %v796_v4, %v796_v4 }
 0x345   :  { %1513 = vmatmul.mubr.msk.bf16.vlgmr.msra.gmra.mrb[28].mxu0 %vm461_vm2, %v797_v13  ;;  %1514 = vmatmul.mubr.msk.bf16.vlgmr.msra.gmra.mrb[28].mxu1 %vm461_vm2, %v797_v13 }
 0x346   :  { %914 = vmatpush1.bf16.msra.mxu0 %v1862_v20  ;;  %955 = vmatpush1.bf16.msra.mxu1 %v1874_v22 }
 0x347   :  { %915 = vmatprep.subr.bf16.mxu0 %v1869_v21  ;;  %956 = vmatprep.subr.bf16.mxu1 %v1881_v23 }
 0x348   :  { %945 = vmatprep.mubr.bf16.mxu0 %v2276_v55  ;;  %986 = vmatprep.mubr.bf16.mxu1 %v2276_v55 }
 0x34a   :  { %916 = vmatpush1.bf16.msra.mxu0 %v1888_v24  ;;  %957 = vmatpush1.bf16.msra.mxu1 %v1901_v26 }
 0x34b   :  { %917 = vmatprep.subr.bf16.mxu0 %v1895_v25  ;;  %958 = vmatprep.subr.bf16.mxu1 %v1917_v29 }
 0x34e   :  { %918 = vmatpush1.bf16.msra.mxu0 %v1912_v28  ;;  %959 = vmatpush1.bf16.msra.mxu1 %v1928_v31 }
 0x34f   :  { %919 = vmatprep.subr.bf16.mxu0 %v1923_v30  ;;  %960 = vmatprep.subr.bf16.mxu1 %v1935_v32 }
 0x352   :  { %920 = vmatpush1.bf16.msra.mxu0 %v1944_v33  ;;  %961 = vmatpush1.bf16.msra.mxu1 %v1951_v34 }
 0x353   :  { %1025 = vmatprep.subr.bf16.mxu0 %v1847_v17  ;;  %1066 = vmatprep.subr.bf16.mxu1 %v1854_v18 }
 0x418   :  { %v835_v14 = vpop.f32.mrb[28].mxu0  ;;  %v876_v27 = vpop.f32.mrb[28].mxu1 }
 0x419   :  { %v887_v8 = vadd.f32 %v835_v14, %v2020_v7  ;;  %v889_v16 = vadd.f32 %v876_v27, %v2023_v9  ;;  %v837_v45 = vpop.f32.mrb[29].mxu0  ;;  %v878_v44 = vpop.f32.mrb[29].mxu1 }
 0x41a   :  { %v888_v46 = vadd.f32 %v837_v45, %v2025_v11  ;;  %v890_v47 = vadd.f32 %v878_v44, %v2028_v12  ;;  %v839_v48 = vpop.f32.mrb[30].mxu0  ;;  %v880_v49 = vpop.f32.mrb[30].mxu1 }
 0x41b   :  { %v891_v50 = vmul.f32 0.5, %v887_v8  ;;  %v840_v51 = vpop.f32.mrb[31].mxu0  ;;  %v881_v38 = vpop.f32.mrb[31].mxu1 }
 0x41c   :  { %v895_v40 = vmul.f32 0.5, %v888_v46  ;;  %v900_v54 = vmul.f32 0.5, %v890_v47 }
 0x41d   :  { %1648 = vtanh.f32 %v891_v50 }
 0x41e   :  { %1650 = vtanh.f32 %v895_v40 }
 0x41f   :  { %1652 = vtanh.f32 %v889_v16 }
 0x420   :  { %1654 = vtanh.f32 %v900_v54 }
 0x427   :  { %v1649_v0 = vpop.eup %1648 }
 0x428   :  { %v1651_v7 = vpop.eup %1650  ;;  %v893_v56 = vadd.f32 1.0, %v1649_v0 }
 0x429   :  { %v897_v9 = vadd.f32 1.0, %v1651_v7  ;;  %v1653_v10 = vpop.eup %1652 }
 0x42a   :  { %v894_v62 = vmul.f32 0.5, %v893_v56  ;;  %v1655_v58 = vpop.eup %1654 }
 0x42b   :  { %v898_v11 = vmul.f32 0.5, %v897_v9  ;;  %v902_v3 = vadd.f32 1.0, %v1655_v58 }
 0x42c   :  { %v905_v1 = vmul.f32 %v1653_v10, %v894_v62 }
 0x42d   :  { %v904_v12 = vmul.f32 %v898_v11, %v794_v59  ;;  %v903_v6 = vmul.f32 0.5, %v902_v3 }
 0x42f   :  { %v906_v36 = vadd.f32 %v905_v1, %v904_v12 }
 0x431   :  { %1656 = vtanh.f32 %v906_v36 }
 0x43b   :  { %v1657_v5 = vpop.eup %1656 }
 0x43c   :  { %v908_v42 = vmul.f32 %v1657_v5, %v903_v6 }
 0x43e   :  { %v909_v53 = vpack.c.bf16 %v908_v42, %v908_v42 }
 0x440   :  { %1515 = vmatmul.mubr.msk.bf16.vlgmr.msra.gmra.mrb[32].mxu0 %vm461_vm2, %v909_v53  ;;  %1516 = vmatmul.mubr.msk.bf16.vlgmr.msra.gmra.mrb[32].mxu1 %vm461_vm2, %v909_v53 }
 0x441   :  { %1026 = vmatpush1.bf16.msra.mxu0 %v1862_v20  ;;  %1067 = vmatpush1.bf16.msra.mxu1 %v1874_v22 }
 0x442   :  { %1027 = vmatprep.subr.bf16.mxu0 %v1869_v21  ;;  %1068 = vmatprep.subr.bf16.mxu1 %v1881_v23 }
 0x443   :  { %1057 = vmatprep.mubr.bf16.mxu0 %v2276_v55  ;;  %1098 = vmatprep.mubr.bf16.mxu1 %v2276_v55 }
 0x445   :  { %1028 = vmatpush1.bf16.msra.mxu0 %v1888_v24  ;;  %1069 = vmatpush1.bf16.msra.mxu1 %v1901_v26 }
 0x446   :  { %1029 = vmatprep.subr.bf16.mxu0 %v1895_v25  ;;  %1070 = vmatprep.subr.bf16.mxu1 %v1917_v29 }
 0x449   :  { %1030 = vmatpush1.bf16.msra.mxu0 %v1912_v28  ;;  %1071 = vmatpush1.bf16.msra.mxu1 %v1928_v31 }
 0x44a   :  { %1031 = vmatprep.subr.bf16.mxu0 %v1923_v30  ;;  %1072 = vmatprep.subr.bf16.mxu1 %v1935_v32 }
 0x44d   :  { %1032 = vmatpush1.bf16.msra.mxu0 %v1944_v33  ;;  %1073 = vmatpush1.bf16.msra.mxu1 %v1951_v34 }
 0x44e   :  { %1137 = vmatprep.subr.bf16.mxu0 %v1847_v17  ;;  %1178 = vmatprep.subr.bf16.mxu1 %v1854_v18 }
 0x513   :  { %v947_v59 = vpop.f32.mrb[32].mxu0  ;;  %v988_v60 = vpop.f32.mrb[32].mxu1 }
 0x514   :  { %v999_v63 = vadd.f32 %v947_v59, %v2030_v15  ;;  %v1001_v4 = vadd.f32 %v988_v60, %v2033_v19  ;;  %v949_v13 = vpop.f32.mrb[33].mxu0  ;;  %v990_v14 = vpop.f32.mrb[33].mxu1 }
 0x515   :  { %v1000_v27 = vadd.f32 %v949_v13, %v2035_v35  ;;  %v1002_v8 = vadd.f32 %v990_v14, %v2038_v37  ;;  %v951_v16 = vpop.f32.mrb[34].mxu0  ;;  %v992_v45 = vpop.f32.mrb[34].mxu1 }
 0x516   :  { %v1003_v44 = vmul.f32 0.5, %v999_v63  ;;  %v952_v46 = vpop.f32.mrb[35].mxu0  ;;  %v993_v47 = vpop.f32.mrb[35].mxu1 }
 0x517   :  { %v1007_v48 = vmul.f32 0.5, %v1000_v27  ;;  %v1012_v49 = vmul.f32 0.5, %v1002_v8 }
 0x518   :  { %1658 = vtanh.f32 %v1003_v44 }
 0x519   :  { %1660 = vtanh.f32 %v1007_v48 }
 0x51a   :  { %1662 = vtanh.f32 %v1001_v4 }
 0x51b   :  { %1664 = vtanh.f32 %v1012_v49 }
 0x522   :  { %v1659_v50 = vpop.eup %1658 }
 0x523   :  { %v1661_v15 = vpop.eup %1660  ;;  %v1005_v51 = vadd.f32 1.0, %v1659_v50 }
 0x524   :  { %v1009_v19 = vadd.f32 1.0, %v1661_v15  ;;  %v1663_v40 = vpop.eup %1662 }
 0x525   :  { %v1006_v38 = vmul.f32 0.5, %v1005_v51  ;;  %v1665_v7 = vpop.eup %1664 }
 0x526   :  { %v1010_v35 = vmul.f32 0.5, %v1009_v19  ;;  %v1014_v56 = vadd.f32 1.0, %v1665_v7 }
 0x527   :  { %v1017_v54 = vmul.f32 %v1663_v40, %v1006_v38 }
 0x528   :  { %v1016_v37 = vmul.f32 %v1010_v35, %v906_v36  ;;  %v1015_v9 = vmul.f32 0.5, %v1014_v56 }
 0x52a   :  { %v1018_v0 = vadd.f32 %v1017_v54, %v1016_v37 }
 0x52c   :  { %1666 = vtanh.f32 %v1018_v0 }
 0x536   :  { %v1667_v62 = vpop.eup %1666 }
 0x537   :  { %v1020_v10 = vmul.f32 %v1667_v62, %v1015_v9 }
 0x539   :  { %v1021_v11 = vpack.c.bf16 %v1020_v10, %v1020_v10 }
 0x53b   :  { %1517 = vmatmul.mubr.msk.bf16.vlgmr.msra.gmra.mrb[36].mxu0 %vm461_vm2, %v1021_v11  ;;  %1518 = vmatmul.mubr.msk.bf16.vlgmr.msra.gmra.mrb[36].mxu1 %vm461_vm2, %v1021_v11  ;;  %v1357_v11 = vld [vmem:[%s2266_s4] sm:$0xff] }
 0x53c   :  { %1138 = vmatpush1.bf16.msra.mxu0 %v1862_v20  ;;  %1179 = vmatpush1.bf16.msra.mxu1 %v1874_v22 }
 0x53d   :  { %1139 = vmatprep.subr.bf16.mxu0 %v1869_v21  ;;  %1180 = vmatprep.subr.bf16.mxu1 %v1881_v23 }
 0x53e   :  { %1169 = vmatprep.mubr.bf16.mxu0 %v2276_v55  ;;  %1210 = vmatprep.mubr.bf16.mxu1 %v2276_v55 }
 0x540   :  { %1140 = vmatpush1.bf16.msra.mxu0 %v1888_v24  ;;  %1181 = vmatpush1.bf16.msra.mxu1 %v1901_v26 }
 0x541   :  { %1141 = vmatprep.subr.bf16.mxu0 %v1895_v25  ;;  %1182 = vmatprep.subr.bf16.mxu1 %v1917_v29 }
 0x544   :  { %1142 = vmatpush1.bf16.msra.mxu0 %v1912_v28  ;;  %1183 = vmatpush1.bf16.msra.mxu1 %v1928_v31 }
 0x545   :  { %1143 = vmatprep.subr.bf16.mxu0 %v1923_v30  ;;  %1184 = vmatprep.subr.bf16.mxu1 %v1935_v32 }
 0x548   :  { %1144 = vmatpush1.bf16.msra.mxu0 %v1944_v33  ;;  %1185 = vmatpush1.bf16.msra.mxu1 %v1951_v34 }
 0x549   :  { %1249 = vmatprep.subr.bf16.mxu0 %v1847_v17  ;;  %1290 = vmatprep.subr.bf16.mxu1 %v1854_v18 }
 0x60e   :  { %v1059_v1 = vpop.f32.mrb[36].mxu0  ;;  %v1100_v12 = vpop.f32.mrb[36].mxu1 }
 0x60f   :  { %v1111_v36 = vadd.f32 %v1059_v1, %v2040_v39  ;;  %v1113_v58 = vadd.f32 %v1100_v12, %v2043_v41  ;;  %v1061_v3 = vpop.f32.mrb[37].mxu0  ;;  %v1102_v6 = vpop.f32.mrb[37].mxu1  ;;  %v1358_v1 = vld [vmem:[%s2266_s4 + $0x8] sm:$0xff] }
 0x610   :  { %v1112_v5 = vadd.f32 %v1061_v3, %v2045_v43  ;;  %v1114_v42 = vadd.f32 %v1102_v6, %v2048_v52  ;;  %v1063_v53 = vpop.f32.mrb[38].mxu0  ;;  %v1104_v59 = vpop.f32.mrb[38].mxu1  ;;  %v1554_v12 = vpack.c.bf16 %v1358_v1, %v1357_v11  ;;  %v1360_v3 = vld [vmem:[%s2266_s4 + $0x18] sm:$0xff] }
 0x611   :  { %v1115_v60 = vmul.f32 0.5, %v1111_v36  ;;  %v1064_v63 = vpop.f32.mrb[39].mxu0  ;;  %v1105_v4 = vpop.f32.mrb[39].mxu1  ;;  %v1777_v36 = vmov 0.0|0.0   ;;  %v1363_v59 = vld [vmem:[%s2266_s4 + $0x30] sm:$0xff] }
 0x612   :  { %v1119_v17 = vmul.f32 0.5, %v1112_v5  ;;  %v1124_v18 = vmul.f32 0.5, %v1114_v42  ;;  %v1361_v5 = vld [vmem:[%s2266_s4 + $0x20] sm:$0xff]  ;;  %v1362_v42 = vld [vmem:[%s2266_s4 + $0x28] sm:$0xff]  ;;  %v1779_v4 = vmov 0.0  }
 0x613   :  { %1668 = vtanh.f32 %v1115_v60  ;;  %v1560_v53 = vpack.c.bf16 %v1362_v42, %v1361_v5  ;;  %v1364_v60 = vld [vmem:[%s2266_s4 + $0x38] sm:$0xff] }
 0x614   :  { %1670 = vtanh.f32 %v1119_v17  ;;  %v1563_v63 = vpack.c.bf16 %v1364_v60, %v1363_v59 }
 0x615   :  { %1672 = vtanh.f32 %v1113_v58  ;;  %v1359_v58 = vld [vmem:[%s2266_s4 + $0x10] sm:$0xff] }
 0x616   :  { %1674 = vtanh.f32 %v1124_v18  ;;  %v1557_v6 = vpack.c.bf16 %v1360_v3, %v1359_v58 }
 0x61d   :  { %v1669_v13 = vpop.eup %1668 }
 0x61e   :  { %v1671_v39 = vpop.eup %1670  ;;  %v1117_v14 = vadd.f32 1.0, %v1669_v13  ;;  %v2278_v13 = vld [vmem:[#allocation13_spill] sm:$0xff] }
 0x61f   :  { %v1121_v41 = vadd.f32 1.0, %v1671_v39  ;;  %v1673_v8 = vpop.eup %1672 }
 0x620   :  { %v1118_v27 = vmul.f32 0.5, %v1117_v14  ;;  %v1675_v44 = vpop.eup %1674  ;;  %v2279_v14 = vld [vmem:[#allocation14_spill] sm:$0xff] }
 0x621   :  { %v1122_v43 = vmul.f32 0.5, %v1121_v41  ;;  %v1126_v46 = vadd.f32 1.0, %v1675_v44 }
 0x622   :  { %v1129_v16 = vmul.f32 %v1673_v8, %v1118_v27 }
 0x623   :  { %v1128_v52 = vmul.f32 %v1122_v43, %v1018_v0  ;;  %v1127_v47 = vmul.f32 0.5, %v1126_v46  ;;  %v2280_v43 = vld [vmem:[#allocation15_spill] sm:$0xff] }
 0x625   :  { %v1130_v45 = vadd.f32 %v1129_v16, %v1128_v52  ;;  %v2281_v52 = vld [vmem:[#allocation16_spill] sm:$0xff] }
 0x627   :  { %1676 = vtanh.f32 %v1130_v45 }
 0x631   :  { %v1677_v48 = vpop.eup %1676 }
 0x632   :  { %v1132_v49 = vmul.f32 %v1677_v48, %v1127_v47 }
 0x634   :  { %v1133_v50 = vpack.c.bf16 %v1132_v49, %v1132_v49 }
 0x636   :  { %1519 = vmatmul.mubr.msk.bf16.vlgmr.msra.gmra.mrb[40].mxu0 %vm461_vm2, %v1133_v50  ;;  %1520 = vmatmul.mubr.msk.bf16.vlgmr.msra.gmra.mrb[40].mxu1 %vm461_vm2, %v1133_v50 }
 0x637   :  { %1250 = vmatpush1.bf16.msra.mxu0 %v1862_v20  ;;  %1291 = vmatpush1.bf16.msra.mxu1 %v1874_v22 }
 0x638   :  { %1251 = vmatprep.subr.bf16.mxu0 %v1869_v21  ;;  %1292 = vmatprep.subr.bf16.mxu1 %v1881_v23 }
 0x639   :  { %1281 = vmatprep.mubr.bf16.mxu0 %v2276_v55  ;;  %1322 = vmatprep.mubr.bf16.mxu1 %v2276_v55 }
 0x63b   :  { %1252 = vmatpush1.bf16.msra.mxu0 %v1888_v24  ;;  %1293 = vmatpush1.bf16.msra.mxu1 %v1901_v26 }
 0x63c   :  { %1253 = vmatprep.subr.bf16.mxu0 %v1895_v25  ;;  %1294 = vmatprep.subr.bf16.mxu1 %v1917_v29 }
 0x63f   :  { %1254 = vmatpush1.bf16.msra.mxu0 %v1912_v28  ;;  %1295 = vmatpush1.bf16.msra.mxu1 %v1928_v31  ;;  %v2277_v28 = vld [vmem:[#allocation12_spill] sm:$0xff] }
 0x640   :  { %1255 = vmatprep.subr.bf16.mxu0 %v1923_v30  ;;  %1296 = vmatprep.subr.bf16.mxu1 %v1935_v32 }
 0x643   :  { %1256 = vmatpush1.bf16.msra.mxu0 %v1944_v33  ;;  %1297 = vmatpush1.bf16.msra.mxu1 %v1951_v34 }
 0x644   :  { %1553 = vmatprep.subr.bf16.mxu0 %v1777_v36 }
 0x709   :  { %v1171_v20 = vpop.f32.mrb[40].mxu0  ;;  %v1212_v21 = vpop.f32.mrb[40].mxu1 }
 0x70a   :  { %v1223_v22 = vadd.f32 %v1171_v20, %v2050_v57  ;;  %v1225_v23 = vadd.f32 %v1212_v21, %v2053_v61  ;;  %v1173_v24 = vpop.f32.mrb[41].mxu0  ;;  %v1214_v25 = vpop.f32.mrb[41].mxu1 }
 0x70b   :  { %v1224_v26 = vadd.f32 %v1173_v24, %v2055_v2  ;;  %v1226_v29 = vadd.f32 %v1214_v25, %v2277_v28  ;;  %v1175_v31 = vpop.f32.mrb[42].mxu0  ;;  %v1216_v30 = vpop.f32.mrb[42].mxu1 }
 0x70c   :  { %v1227_v55 = vmul.f32 0.5, %v1223_v22  ;;  %v1176_v32 = vpop.f32.mrb[43].mxu0  ;;  %v1217_v15 = vpop.f32.mrb[43].mxu1 }
 0x70d   :  { %v1231_v33 = vmul.f32 0.5, %v1224_v26  ;;  %v1236_v34 = vmul.f32 0.5, %v1226_v29 }
 0x70e   :  { %1678 = vtanh.f32 %v1227_v55 }
 0x70f   :  { %1680 = vtanh.f32 %v1231_v33 }
 0x710   :  { %1682 = vtanh.f32 %v1225_v23 }
 0x711   :  { %1684 = vtanh.f32 %v1236_v34 }
 0x718   :  { %v1679_v51 = vpop.eup %1678 }
 0x719   :  { %v1681_v57 = vpop.eup %1680  ;;  %v1229_v19 = vadd.f32 1.0, %v1679_v51  ;;  %v1523_v51 = vld [vmem:[%s2267_s5] ss:$0 sm:$0xff] }
 0x71a   :  { %v1233_v61 = vadd.f32 1.0, %v1681_v57  ;;  %v1683_v40 = vpop.eup %1682 }
 0x71b   :  { %v1230_v38 = vmul.f32 0.5, %v1229_v19  ;;  %v1685_v0 = vpop.eup %1684 }
 0x71c   :  { %v1234_v2 = vmul.f32 0.5, %v1233_v61  ;;  %v1238_v7 = vadd.f32 1.0, %v1685_v0 }
 0x71d   :  { %v1241_v35 = vmul.f32 %v1683_v40, %v1230_v38 }
 0x71e   :  { %v1240_v54 = vmul.f32 %v1234_v2, %v1130_v45  ;;  %v1239_v56 = vmul.f32 0.5, %v1238_v7 }
 0x720   :  { %v1242_v37 = vadd.f32 %v1241_v35, %v1240_v54 }
 0x722   :  { %1686 = vtanh.f32 %v1242_v37 }
 0x72c   :  { %v1687_v9 = vpop.eup %1686 }
 0x72d   :  { %v1244_v62 = vmul.f32 %v1687_v9, %v1239_v56 }
 0x72f   :  { %v1245_v10 = vpack.c.bf16 %v1244_v62, %v1244_v62 }
 0x731   :  { %1521 = vmatmul.mubr.msk.bf16.vlgmr.msra.gmra.mrb[44].mxu0 %vm461_vm2, %v1245_v10  ;;  %1522 = vmatmul.mubr.msk.bf16.vlgmr.msra.gmra.mrb[44].mxu1 %vm461_vm2, %v1245_v10 }
 0x732   :  { %1555 = vmatpush3.bf16.msra.mxu0 %v1554_v12  ;;  %1550 = vmatprep.mubr.msk.f32.mxu0 %vm1778_vm3, %v1779_v4 }
 0x733   :  { %1556 = vmatprep.subr.bf16.mxu0 %v1777_v36 }
 0x736   :  { %1558 = vmatpush3.bf16.msra.mxu0 %v1557_v6 }
 0x737   :  { %1559 = vmatprep.subr.bf16.mxu0 %v1777_v36 }
 0x73a   :  { %1561 = vmatpush3.bf16.msra.mxu0 %v1560_v53 }
 0x73b   :  { %1562 = vmatprep.subr.bf16.mxu0 %v1777_v36 }
 0x73e   :  { %1564 = vmatpush3.bf16.msra.mxu0 %v1563_v63 }
 0x804   :  { %v1283_v17 = vpop.f32.mrb[44].mxu0  ;;  %v1324_v18 = vpop.f32.mrb[44].mxu1 }
 0x805   :  { %v1335_v39 = vadd.f32 %v1283_v17, %v2278_v13  ;;  %v1337_v41 = vadd.f32 %v1324_v18, %v2279_v14  ;;  %v1285_v27 = vpop.f32.mrb[45].mxu0  ;;  %v1326_v8 = vpop.f32.mrb[45].mxu1 }
 0x806   :  { %v1336_v16 = vadd.f32 %v1285_v27, %v2280_v43  ;;  %v1338_v45 = vadd.f32 %v1326_v8, %v2281_v52  ;;  %v1287_v44 = vpop.f32.mrb[46].mxu0  ;;  %v1328_v46 = vpop.f32.mrb[46].mxu1 }
 0x807   :  { %v1339_v47 = vmul.f32 0.5, %v1335_v39  ;;  %v1288_v48 = vpop.f32.mrb[47].mxu0  ;;  %v1329_v49 = vpop.f32.mrb[47].mxu1 }
 0x808   :  { %v1343_v50 = vmul.f32 0.5, %v1336_v16  ;;  %v1348_v20 = vmul.f32 0.5, %v1338_v45 }
 0x809   :  { %1688 = vtanh.f32 %v1339_v47 }
 0x80a   :  { %1690 = vtanh.f32 %v1343_v50 }
 0x80b   :  { %1692 = vtanh.f32 %v1337_v41 }
 0x80c   :  { %1694 = vtanh.f32 %v1348_v20 }
 0x813   :  { %v1689_v21 = vpop.eup %1688 }
 0x814   :  { %v1691_v22 = vpop.eup %1690  ;;  %v1341_v23 = vadd.f32 1.0, %v1689_v21 }
 0x815   :  { %v1345_v24 = vadd.f32 1.0, %v1691_v22  ;;  %v1693_v26 = vpop.eup %1692 }
 0x816   :  { %v1342_v25 = vmul.f32 0.5, %v1341_v23  ;;  %v1695_v55 = vpop.eup %1694 }
 0x817   :  { %v1346_v28 = vmul.f32 0.5, %v1345_v24  ;;  %v1350_v32 = vadd.f32 1.0, %v1695_v55 }
 0x818   :  { %v1353_v29 = vmul.f32 %v1693_v26, %v1342_v25 }
 0x819   :  { %v1352_v31 = vmul.f32 %v1346_v28, %v1242_v37  ;;  %v1351_v15 = vmul.f32 0.5, %v1350_v32 }
 0x81b   :  { %v1354_v30 = vadd.f32 %v1353_v29, %v1352_v31 }
 0x81d   :  { %1696 = vtanh.f32 %v1354_v30 }
 0x827   :  { %v1697_v33 = vpop.eup %1696 }
 0x828   :  { %v1356_v34 = vmul.f32 %v1697_v33, %v1351_v15 }
 0x82a   :  { %1551 = vmatmul.mubr.msk.f32.vlgmr.msra.gmra.mrb[48].mxu0 %vm461_vm2, %v1356_v34 }
 0x8fd   :  { %v1441_v57 = vpop.f32.mrb[48].mxu0 }
 0x8fe   :  { %v1442_v19 = vadd.f32 %v1523_v51, %v1441_v57  ;;  %v1552_v61 = vpop.f32.mrb[49].mxu0 }
 0x900   :  { %v1445_v38 = vmul.f32 0.5, %v1442_v19 }
 0x902   :  { %1698 = vtanh.f32 %v1445_v38 }
 0x90c   :  { %v1699_v40 = vpop.eup %1698 }
 0x90d   :  { %v1447_v2 = vadd.f32 1.0, %v1699_v40 }
 0x90f   :  { %v1448_v35 = vmul.f32 0.5, %v1447_v2 }
 0x911   :  { %1450 = vst.msk [vmem:[#allocation8] sm:$0xff] %vm1449_vm4, %v1448_v35 }
 0x912   :  { %1755 = shalt.err (!%p1752_p6)
}
 0x913   :  { %s1756_s28 = scalar_lea.hbm %s2268_s6, 128 }
 0x914   :  { %p1757_p7 = scmp.ne.s32.totalorder %s2268_s6, %s1756_s28  ;;  %p1760_p8 = scmp.lt.u32.totalorder %s1756_s28, %s2268_s6 }
 0x916   :  { %p1762_p9 = pnand %p1760_p8, %p1757_p7 }
 0x918   :  { %1765 = shalt.err (!%p1762_p9)
}
 0x919   :  { %1460 = dma.vmem_to_hbm [thread:$0]  %s1458_s25, 128, %s2268_s6, [#allocation5]  }
 0x91a   :  { %1770 = dma.done.wait [#allocation5], 128  }
 0x91b   :  { %1771 = vsyncadd [#allocation5], 4294967168 }
 0x91c   :  { %1464 = vsyncpa [#allocation4], 1 }
 0x91d   :  { %1465 = vsyncpa [#allocation7], 1 }
 0x91e   :  { %1466 = vsyncpa [#allocation5], 1 }

</bundles_post_ra>
